<compile_context>
chip_gen: v7x
topology: tpu7x:2x2x1
jax: 0.10.0
libtpu: 0.0.40
codegen_flags: <defaults>
</compile_context>

<pallas_src>
import functools

import jax
import jax.numpy as jnp
from jax.experimental import pallas as pl
from jax.experimental.pallas import tpu as pltpu

LANE = 128


def _round_up(x, m):
    return (x + m - 1) // m * m


def _default_num_batch_tiles():
    """1 grid step on single-TC chips (v5e/v6e); 2 on v7x (2 TCs/chip)."""
    try:
        kind = jax.devices()[0].device_kind.lower()
    except Exception:
        return 1
    return 2 if ("v7" in kind or "7x" in kind) else 1


def _pick_tiling(batch, num_batch_tiles=None, max_tb=2048):
    """Returns (padded_batch, tb); tb is a multiple of 128 (lane axis)."""
    if num_batch_tiles is None:
        num_batch_tiles = _default_num_batch_tiles()
    num_batch_tiles = max(1, num_batch_tiles)
    # Cap tile size so large batches still fit comfortably in VMEM (v7x: 64 MiB).
    num_batch_tiles = max(num_batch_tiles, pl.cdiv(batch, max_tb))
    b_pad = _round_up(batch, LANE * num_batch_tiles)
    return b_pad, b_pad // num_batch_tiles


# ----------------------------- Pallas kernel --------------------------------

def _make_ziln_kernel(n_layers):
    """One batch tile (lanes = batch, sublanes = features): MLP stack + ZILN head."""
    assert n_layers >= 1, "ZILNMLP always has at least one DenseLayer"

    def kernel(x_ref, *refs):
        # refs = (w0^T, b0, w1^T, b1, ..., out_ref)
        out_ref = refs[-1]
        wb = refs[:-1]

        h = x_ref[...]                          # bf16 (128, tb): feat x batch
        hf = None
        for l in range(n_layers):
            w_t = wb[2 * l][...]                # bf16 (Np_out, Np_in), zero-padded
            b = wb[2 * l + 1][...]              # f32  (Np_out, 1),    zero-padded
            # bf16 operands, f32 MXU accumulation; padded rows/cols stay exactly 0
            # after ReLU because the pads are zeros.
            acc = jnp.dot(w_t, h, preferred_element_type=jnp.float32) + b
            hf = jnp.maximum(acc, 0.0)          # f32 (Np_out, tb)
            if l + 1 < n_layers:
                h = hf.astype(jnp.bfloat16)

        # Rows 0..2 of hf hold the three ZILN logits for every batch lane.
        # Extract the narrow rows FIRST, then run transcendentals on (1, tb) only.
        l0 = hf[0:1, :]
        l1 = hf[1:2, :]
        l2 = hf[2:3, :]

        p_pos = jax.nn.sigmoid(l0)
        # single-exp stable softplus: max(s, 0) + log1p(exp(-|s|))
        sp = jnp.maximum(l2, 0.0) + jnp.log1p(jnp.exp(-jnp.abs(l2)))

        # Lane-dense (1, tb) store; wrapper slices the first B lanes.
        out_ref[...] = p_pos * jnp.exp(l1 + 0.5 * sp * sp)

    return kernel


# ----------------------------- parameter prep --------------------------------

def prepare_ziln_params(weights, biases):
    """One-time padding of parameters (hoisted out of the per-call hot path).

    Returns (flat_params, pdims):
      flat_params = (W0^T padded bf16 (128,128), b0 padded f32 (128,1), W1^T, b1, ...)
      pdims       = per-layer feature widths padded to 128 lanes.
    """
    n_layers = len(weights)
    assert n_layers >= 1, "ZILNMLP always has at least one DenseLayer"
    dims = [weights[0].shape[0]] + [w.shape[1] for w in weights]
    pdims = tuple(_round_up(d, LANE) for d in dims)

    flat = []
    for l, (w, b) in enumerate(zip(weights, biases)):
        kin, kout = w.shape
        w_t = jnp.zeros((pdims[l + 1], pdims[l]), jnp.bfloat16)
        w_t = w_t.at[:kout, :kin].set(jnp.asarray(w).T.astype(jnp.bfloat16))
        b_col = jnp.zeros((pdims[l + 1], 1), jnp.float32)
        b_col = b_col.at[:kout, :].set(jnp.asarray(b, jnp.float32).reshape(kout, 1))
        flat += [w_t, b_col]
    return tuple(flat), pdims


# ------------------------------- pallas_call ---------------------------------

def _ziln_pallas_call(x_t, flat_params, pdims, tb):
    """x_t: (Dp, Bp) bf16 feature-major input.  Returns (1, Bp) f32."""
    d_pad, b_pad = x_t.shape
    n_layers = len(flat_params) // 2

    in_specs = [pl.BlockSpec((d_pad, tb), lambda i: (0, i))]
    for l in range(n_layers):
        w_t, b_col = flat_params[2 * l], flat_params[2 * l + 1]
        # Whole-array constant-index blocks: DMA'd once, resident in VMEM across
        # the (parallel) batch grid (tiny, ~100 KiB total).
        in_specs.append(pl.BlockSpec(w_t.shape, lambda i: (0, 0)))
        in_specs.append(pl.BlockSpec(b_col.shape, lambda i: (0, 0)))

    flops = 2 * b_pad * sum(pdims[l] * pdims[l + 1] for l in range(n_layers))
    bytes_accessed = (
        int(x_t.size) * x_t.dtype.itemsize
        + sum(int(p.size) * p.dtype.itemsize for p in flat_params)
        + b_pad * 4
    )
    cost = pl.CostEstimate(
        flops=flops, transcendentals=4 * b_pad, bytes_accessed=bytes_accessed
    )

    return pl.pallas_call(
        _make_ziln_kernel(n_layers),
        out_shape=jax.ShapeDtypeStruct((1, b_pad), jnp.float32),
        grid_spec=pltpu.PrefetchScalarGridSpec(
            num_scalar_prefetch=0,
            grid=(b_pad // tb,),
            in_specs=in_specs,
            out_specs=pl.BlockSpec((1, tb), lambda i: (0, i)),
        ),
        compiler_params=pltpu.CompilerParams(
            dimension_semantics=("parallel",),  # shards batch grid across TCs (v7x)
        ),
        cost_estimate=cost,
    )(x_t, *flat_params)


# ------------------------------- forward glue --------------------------------

def ziln_forward(data, emb_tables, flat_params, *, pdims, n_categorical,
                 num_batch_tiles=None):
    """Full ZILNMLP forward: embedding glue + Pallas MLP/head.  Returns [B, 1] f32."""
    batch = data.shape[0]
    cat_ids = data[:, :n_categorical].astype(jnp.int32)          # torch .long()
    embedded = [emb_tables[i][cat_ids[:, i]] for i in range(n_categorical)]
    numerical = data[:, n_categorical:]

    d_real = sum(int(e.shape[1]) for e in embedded) + int(numerical.shape[1])
    d_pad = pdims[0]
    b_pad, tb = _pick_tiling(batch, num_batch_tiles)

    # Build the feature-major (transposed), lane-padded input in ONE concat
    # (the zero-pad block is part of the concat; no zeros().at[].set() pass).
    parts = [e.T for e in embedded] + [numerical.T]
    if d_pad > d_real:
        parts.append(jnp.zeros((d_pad - d_real, batch), numerical.dtype))
    x_t = jnp.concatenate(parts, axis=0).astype(jnp.bfloat16)     # (Dp, B)
    if b_pad > batch:
        x_t = jnp.pad(x_t, ((0, 0), (0, b_pad - batch)))          # (Dp, Bp)

    out_row = _ziln_pallas_call(x_t, flat_params, pdims, tb)      # (1, Bp) f32
    return out_row[0, :batch].reshape(batch, 1)


# --------------------------- plain-JAX references -----------------------------

def ziln_mlp_ref(x_emb, weights, biases, matmul_dtype=jnp.float32):
    """Reference. With matmul_dtype=bf16 it mirrors the kernel's dtype choices."""
    h = x_emb.astype(jnp.float32)
    for w, b in zip(weights, biases):
        acc = jnp.dot(
            h.astype(matmul_dtype),
            w.astype(matmul_dtype),
            preferred_element_type=jnp.float32,
        ) + b.astype(jnp.float32)
        h = jnp.maximum(acc, 0.0)
    positive_probs = jax.nn.sigmoid(h[:, 0:1])
    loc = h[:, 1:2]
    scale = jax.nn.softplus(h[:, 2:3])
    return positive_probs * jnp.exp(loc + 0.5 * jnp.square(scale))


# --------------------------------- main --------------------------------------

if __name__ == "__main__":
    # Module hyperparameters (small, consistent with ZILNMLP.__init__)
    n_categorical = 2
    n_numerical = 4
    vocab_sizes = [8, 10]
    emb_dims = [4, 4]
    layer_dims = [32, 16]
    output_dim = 3
    B = 512

    key = jax.random.PRNGKey(0)
    keys = jax.random.split(key, 16)

    # Deterministic synthetic parameters (not a checkpoint load).
    emb_tables = [
        0.1 * jax.random.normal(keys[i], (vocab_sizes[i], emb_dims[i]), jnp.float32)
        for i in range(n_categorical)
    ]

    input_dim = sum(emb_dims) + n_numerical
    dims = [input_dim] + list(layer_dims) + [output_dim]
    weights, biases = [], []
    for li in range(len(dims) - 1):
        weights.append(
            0.2 * jax.random.normal(keys[4 + li], (dims[li], dims[li + 1]), jnp.float32)
        )
        biases.append(
            0.05 * jax.random.normal(keys[8 + li], (1, dims[li + 1]), jnp.float32)
        )

    # Input `data`: first n_categorical columns are integer indices stored as
    # floats (torch does .long() on them), rest are numerical features.
    cat_idx = jax.random.randint(keys[12], (B, n_categorical), 0, min(vocab_sizes))
    num_feats = jax.random.normal(keys[13], (B, n_numerical), jnp.float32)
    data = jnp.concatenate([cat_idx.astype(jnp.float32), num_feats], axis=1)

    # One-time parameter padding (hoisted out of the hot path, reused every call).
    flat_params, pdims = prepare_ziln_params(weights, biases)

    fwd = jax.jit(functools.partial(
        ziln_forward, pdims=pdims, n_categorical=n_categorical))
    out = jax.block_until_ready(fwd(data, emb_tables, flat_params))

    # References on the same embedded input.
    cat_ids = data[:, :n_categorical].astype(jnp.int32)
    embedded = [emb_tables[i][cat_ids[:, i]] for i in range(n_categorical)]
    x_emb = jnp.concatenate(embedded + [data[:, n_categorical:]], axis=1)  # [B, 12]
    ref_mirror = ziln_mlp_ref(x_emb, weights, biases, matmul_dtype=jnp.bfloat16)
    ref_f32 = ziln_mlp_ref(x_emb, weights, biases)

    assert out.shape == (B, 1)
    # Tight check vs a reference mirroring the kernel's bf16 matmul inputs.
    assert jnp.allclose(out, ref_mirror, atol=1e-4, rtol=1e-4), (
        float(jnp.max(jnp.abs(out - ref_mirror)))
    )
    # Looser check vs the pure-f32 reference (bf16 matmul rounding only).
    assert jnp.allclose(out, ref_f32, atol=5e-2, rtol=1e-1), (
        float(jnp.max(jnp.abs(out - ref_f32)))
    )

    print("KERNEL_OK")
</pallas_src>

<mosaic_0001>
module attributes {stable_mosaic.version = 11 : i64} {
  func.func @kernel(%arg0: i32, %arg1: memref<128x512xbf16, #tpu.memory_space<vmem>>, %arg2: memref<128x128xbf16, #tpu.memory_space<vmem>>, %arg3: memref<128x1xf32, #tpu.memory_space<vmem>>, %arg4: memref<128x128xbf16, #tpu.memory_space<vmem>>, %arg5: memref<128x1xf32, #tpu.memory_space<vmem>>, %arg6: memref<128x128xbf16, #tpu.memory_space<vmem>>, %arg7: memref<128x1xf32, #tpu.memory_space<vmem>>, %arg8: memref<1x512xf32, #tpu.memory_space<vmem>>) attributes {dimension_semantics = [#tpu.dimension_semantics<parallel>], iteration_bounds = array<i64: 1>, scalar_prefetch = 0 : i64, scratch_operands = 0 : i64, tpu.core_type = #tpu.core_type<tc>, window_params = [{transform_indices = @transform_0, window_bounds = array<i64: 128, 512>}, {pipeline_mode = #tpu.pipeline_mode<synchronous>, transform_indices = @transform_1, window_bounds = array<i64: 128, 128>}, {pipeline_mode = #tpu.pipeline_mode<synchronous>, transform_indices = @transform_2, window_bounds = array<i64: 128, 1>}, {pipeline_mode = #tpu.pipeline_mode<synchronous>, transform_indices = @transform_3, window_bounds = array<i64: 128, 128>}, {pipeline_mode = #tpu.pipeline_mode<synchronous>, transform_indices = @transform_4, window_bounds = array<i64: 128, 1>}, {pipeline_mode = #tpu.pipeline_mode<synchronous>, transform_indices = @transform_5, window_bounds = array<i64: 128, 128>}, {pipeline_mode = #tpu.pipeline_mode<synchronous>, transform_indices = @transform_6, window_bounds = array<i64: 128, 1>}, {transform_indices = @transform_7, window_bounds = array<i64: 1, 512>}]} {
    %c0 = arith.constant 0 : index
    %c0_0 = arith.constant 0 : index
    %0 = vector.load %arg1[%c0, %c0_0] : memref<128x512xbf16, #tpu.memory_space<vmem>>, vector<128x512xbf16>
    %c0_1 = arith.constant 0 : index
    %c0_2 = arith.constant 0 : index
    %1 = vector.load %arg2[%c0_1, %c0_2] : memref<128x128xbf16, #tpu.memory_space<vmem>>, vector<128x128xbf16>
    %c0_3 = arith.constant 0 : index
    %c0_4 = arith.constant 0 : index
    %2 = vector.load %arg3[%c0_3, %c0_4] : memref<128x1xf32, #tpu.memory_space<vmem>>, vector<128x1xf32>
    %cst = arith.constant dense<0.000000e+00> : vector<128x512xf32>
    %3 = tpu.matmul %1, %0, %cst {dimension_numbers = #tpu.dot_dimension_numbers<[1], [0], [0], [1], [0, 0, 1, 1], [], []>} : vector<128x128xbf16>, vector<128x512xbf16>, vector<128x512xf32> -> vector<128x512xf32>
    %4 = vector.broadcast %2 : vector<128x1xf32> to vector<128x512xf32>
    %5 = arith.addf %3, %4 : vector<128x512xf32>
    %cst_5 = arith.constant 0.000000e+00 : f32
    %6 = vector.broadcast %cst_5 : f32 to vector<128x512xf32>
    %7 = arith.maximumf %5, %6 : vector<128x512xf32>
    %8 = arith.truncf %7 : vector<128x512xf32> to vector<128x512xbf16>
    %c0_6 = arith.constant 0 : index
    %c0_7 = arith.constant 0 : index
    %9 = vector.load %arg4[%c0_6, %c0_7] : memref<128x128xbf16, #tpu.memory_space<vmem>>, vector<128x128xbf16>
    %c0_8 = arith.constant 0 : index
    %c0_9 = arith.constant 0 : index
    %10 = vector.load %arg5[%c0_8, %c0_9] : memref<128x1xf32, #tpu.memory_space<vmem>>, vector<128x1xf32>
    %cst_10 = arith.constant dense<0.000000e+00> : vector<128x512xf32>
    %11 = tpu.matmul %9, %8, %cst_10 {dimension_numbers = #tpu.dot_dimension_numbers<[1], [0], [0], [1], [0, 0, 1, 1], [], []>} : vector<128x128xbf16>, vector<128x512xbf16>, vector<128x512xf32> -> vector<128x512xf32>
    %12 = vector.broadcast %10 : vector<128x1xf32> to vector<128x512xf32>
    %13 = arith.addf %11, %12 : vector<128x512xf32>
    %cst_11 = arith.constant 0.000000e+00 : f32
    %14 = vector.broadcast %cst_11 : f32 to vector<128x512xf32>
    %15 = arith.maximumf %13, %14 : vector<128x512xf32>
    %16 = arith.truncf %15 : vector<128x512xf32> to vector<128x512xbf16>
    %c0_12 = arith.constant 0 : index
    %c0_13 = arith.constant 0 : index
    %17 = vector.load %arg6[%c0_12, %c0_13] : memref<128x128xbf16, #tpu.memory_space<vmem>>, vector<128x128xbf16>
    %c0_14 = arith.constant 0 : index
    %c0_15 = arith.constant 0 : index
    %18 = vector.load %arg7[%c0_14, %c0_15] : memref<128x1xf32, #tpu.memory_space<vmem>>, vector<128x1xf32>
    %cst_16 = arith.constant dense<0.000000e+00> : vector<128x512xf32>
    %19 = tpu.matmul %17, %16, %cst_16 {dimension_numbers = #tpu.dot_dimension_numbers<[1], [0], [0], [1], [0, 0, 1, 1], [], []>} : vector<128x128xbf16>, vector<128x512xbf16>, vector<128x512xf32> -> vector<128x512xf32>
    %20 = vector.broadcast %18 : vector<128x1xf32> to vector<128x512xf32>
    %21 = arith.addf %19, %20 : vector<128x512xf32>
    %cst_17 = arith.constant 0.000000e+00 : f32
    %22 = vector.broadcast %cst_17 : f32 to vector<128x512xf32>
    %23 = arith.maximumf %21, %22 : vector<128x512xf32>
    %24 = vector.extract_strided_slice %23 {offsets = [0, 0], sizes = [1, 512], strides = [1, 1]} : vector<128x512xf32> to vector<1x512xf32>
    %25 = vector.extract_strided_slice %23 {offsets = [1, 0], sizes = [1, 512], strides = [1, 1]} : vector<128x512xf32> to vector<1x512xf32>
    %26 = vector.extract_strided_slice %23 {offsets = [2, 0], sizes = [1, 512], strides = [1, 1]} : vector<128x512xf32> to vector<1x512xf32>
    %27 = arith.negf %24 : vector<1x512xf32>
    %28 = math.exp %27 : vector<1x512xf32>
    %cst_18 = arith.constant 1.000000e+00 : f32
    %29 = vector.broadcast %cst_18 : f32 to vector<1x512xf32>
    %30 = arith.addf %29, %28 : vector<1x512xf32>
    %31 = arith.divf %29, %30 : vector<1x512xf32>
    %cst_19 = arith.constant 0.000000e+00 : f32
    %32 = vector.broadcast %cst_19 : f32 to vector<1x512xf32>
    %33 = arith.maximumf %26, %32 : vector<1x512xf32>
    %34 = math.absf %26 : vector<1x512xf32>
    %cst_20 = arith.constant 0.000000e+00 : f32
    %35 = vector.broadcast %cst_20 : f32 to vector<1x512xf32>
    %36 = arith.subf %35, %34 : vector<1x512xf32>
    %37 = math.exp %36 : vector<1x512xf32>
    %38 = math.log1p %37 : vector<1x512xf32>
    %39 = arith.addf %33, %38 : vector<1x512xf32>
    %cst_21 = arith.constant 5.000000e-01 : f32
    %40 = vector.broadcast %cst_21 : f32 to vector<1x512xf32>
    %41 = arith.mulf %40, %39 : vector<1x512xf32>
    %42 = arith.mulf %41, %39 : vector<1x512xf32>
    %43 = arith.addf %25, %42 : vector<1x512xf32>
    %44 = math.exp %43 : vector<1x512xf32>
    %45 = arith.mulf %31, %44 : vector<1x512xf32>
    %c0_22 = arith.constant 0 : index
    %c0_23 = arith.constant 0 : index
    %46 = vector.load %arg8[%c0_22, %c0_23] : memref<1x512xf32, #tpu.memory_space<vmem>>, vector<1x512xf32>
    tpu.vector_store %arg8[%c0_22, %c0_23], %45 {strides = array<i32>} : memref<1x512xf32, #tpu.memory_space<vmem>>, vector<1x512xf32>,
    return
  }
  func.func @transform_0(%arg0: i32) -> (i32, i32) {
    %c0_i32 = arith.constant 0 : i32
    %c0_i32_0 = arith.constant 0 : i32
    return %c0_i32, %arg0 : i32, i32
  }
  func.func @transform_1(%arg0: i32) -> (i32, i32) {
    %c0_i32 = arith.constant 0 : i32
    %c0_i32_0 = arith.constant 0 : i32
    %c0_i32_1 = arith.constant 0 : i32
    return %c0_i32, %c0_i32_0 : i32, i32
  }
  func.func @transform_2(%arg0: i32) -> (i32, i32) {
    %c0_i32 = arith.constant 0 : i32
    %c0_i32_0 = arith.constant 0 : i32
    %c0_i32_1 = arith.constant 0 : i32
    return %c0_i32, %c0_i32_0 : i32, i32
  }
  func.func @transform_3(%arg0: i32) -> (i32, i32) {
    %c0_i32 = arith.constant 0 : i32
    %c0_i32_0 = arith.constant 0 : i32
    %c0_i32_1 = arith.constant 0 : i32
    return %c0_i32, %c0_i32_0 : i32, i32
  }
  func.func @transform_4(%arg0: i32) -> (i32, i32) {
    %c0_i32 = arith.constant 0 : i32
    %c0_i32_0 = arith.constant 0 : i32
    %c0_i32_1 = arith.constant 0 : i32
    return %c0_i32, %c0_i32_0 : i32, i32
  }
  func.func @transform_5(%arg0: i32) -> (i32, i32) {
    %c0_i32 = arith.constant 0 : i32
    %c0_i32_0 = arith.constant 0 : i32
    %c0_i32_1 = arith.constant 0 : i32
    return %c0_i32, %c0_i32_0 : i32, i32
  }
  func.func @transform_6(%arg0: i32) -> (i32, i32) {
    %c0_i32 = arith.constant 0 : i32
    %c0_i32_0 = arith.constant 0 : i32
    %c0_i32_1 = arith.constant 0 : i32
    return %c0_i32, %c0_i32_0 : i32, i32
  }
  func.func @transform_7(%arg0: i32) -> (i32, i32) {
    %c0_i32 = arith.constant 0 : i32
    %c0_i32_0 = arith.constant 0 : i32
    return %c0_i32, %arg0 : i32, i32
  }
}

</mosaic_0001>

<bundles_post_ra>
// kernel: ziln_forward.1
= control target key start
LH: loop header
LB: loop body
LE: loop exit
PB: predicated region body
PF: predicated region fallthrough
CT: control target
= control target key end

     0   :  { %v1880_v2 = vmov 0   ;;  %s2288_s0 = inlined_call_operand.vmem [shape: bf16[128,512], index: 0, kind: input, shape index: {}]   ;;  %s2289_s1 = inlined_call_operand.vmem [shape: bf16[128,128], index: 1, kind: input, shape index: {}]   ;;  %s2290_s2 = inlined_call_operand.vmem [shape: f32[128,1], index: 2, kind: input, shape index: {}]   ;;  %s2291_s3 = inlined_call_operand.vmem [shape: bf16[128,128], index: 3, kind: input, shape index: {}]   ;;  %s2292_s4 = inlined_call_operand.vmem [shape: f32[128,1], index: 4, kind: input, shape index: {}]   ;;  %s2293_s5 = inlined_call_operand.vmem [shape: bf16[128,128], index: 5, kind: input, shape index: {}]   ;;  %s2294_s6 = inlined_call_operand.vmem [shape: f32[128,1], index: 6, kind: input, shape index: {}]   ;;  %s2295_s7 = inlined_call_operand.hbm [shape: f32[1,512], index: 7, kind: output, shape index: {}]  }
   0x1   :  { %v1744_v0 = vld [vmem:[%s2288_s0 + $0x4] ss:$16 sps:$4 sm:$0xff]   ;;  %v1746_v1 = vld [vmem:[%s2288_s0 + $0xc] ss:$16 sps:$4 sm:$0xff]   ;;  %412 = vmatprep.mubr.bf16.mxu0 %v1880_v2  ;;  %525 = vmatprep.mubr.bf16.mxu1 %v1880_v2  ;;  %v1748_v3 = vld [vmem:[%s2288_s0] ss:$16 sps:$4 sm:$0xff]  }
   0x2   :  { %380 = vmatprep.subr.bf16.mxu0 %v1744_v0  ;;  %v1749_v4 = vld [vmem:[%s2288_s0 + $0x8] ss:$16 sps:$4 sm:$0xff]   ;;  %1742 = vset.pattern.permute.xlu0 %v1880_v2  ;;  %v1750_v5 = vld [vmem:[%s2288_s0 + $0x24] ss:$16 sps:$4 sm:$0xff]   ;;  %v1752_v6 = vld [vmem:[%s2288_s0 + $0x2c] ss:$16 sps:$4 sm:$0xff]  }
   0x3   :  { %493 = vmatprep.subr.bf16.mxu1 %v1746_v1  ;;  %1743 = vset.pattern.permute.xlu1 %v1880_v2  ;;  %v1754_v7 = vld [vmem:[%s2288_s0 + $0x20] ss:$16 sps:$4 sm:$0xff]   ;;  %v1755_v8 = vld [vmem:[%s2288_s0 + $0x28] ss:$16 sps:$4 sm:$0xff]   ;;  %v1756_v9 = vld [vmem:[%s2288_s0 + $0x44] ss:$16 sps:$4 sm:$0xff]  }
   0x4   :  { %381 = vmatpush1.bf16.msra.mxu0 %v1748_v3  ;;  %494 = vmatpush1.bf16.msra.mxu1 %v1749_v4  ;;  %v1758_v10 = vld [vmem:[%s2288_s0 + $0x4c] ss:$16 sps:$4 sm:$0xff]   ;;  %v1760_v11 = vld [vmem:[%s2288_s0 + $0x40] ss:$16 sps:$4 sm:$0xff]   ;;  %v1761_v12 = vld [vmem:[%s2288_s0 + $0x48] ss:$16 sps:$4 sm:$0xff]  }
   0x5   :  { %382 = vmatprep.subr.bf16.mxu0 %v1750_v5  ;;  %495 = vmatprep.subr.bf16.mxu1 %v1752_v6  ;;  %v1762_v13 = vld [vmem:[%s2288_s0 + $0x64] ss:$16 sps:$4 sm:$0xff]   ;;  %v1764_v14 = vld [vmem:[%s2288_s0 + $0x6c] ss:$16 sps:$4 sm:$0xff]   ;;  %v1766_v15 = vld [vmem:[%s2288_s0 + $0x60] ss:$16 sps:$4 sm:$0xff]  }
   0x6   :  { %v1767_v16 = vld [vmem:[%s2288_s0 + $0x68] ss:$16 sps:$4 sm:$0xff]   ;;  %v1768_v17 = vld [vmem:[%s2288_s0 + $0x84] ss:$16 sps:$4 sm:$0xff]   ;;  %v1770_v18 = vld [vmem:[%s2288_s0 + $0x8c] ss:$16 sps:$4 sm:$0xff]  }
   0x7   :  { %v1772_v19 = vld [vmem:[%s2288_s0 + $0x80] ss:$16 sps:$4 sm:$0xff]   ;;  %v1773_v20 = vld [vmem:[%s2288_s0 + $0x88] ss:$16 sps:$4 sm:$0xff]   ;;  %v1774_v21 = vld [vmem:[%s2288_s0 + $0xa4] ss:$16 sps:$4 sm:$0xff]  }
   0x8   :  { %383 = vmatpush1.bf16.msra.mxu0 %v1754_v7  ;;  %496 = vmatpush1.bf16.msra.mxu1 %v1755_v8  ;;  %v1776_v22 = vld [vmem:[%s2288_s0 + $0xac] ss:$16 sps:$4 sm:$0xff]   ;;  %v1778_v23 = vld [vmem:[%s2288_s0 + $0xa0] ss:$16 sps:$4 sm:$0xff]   ;;  %v1779_v24 = vld [vmem:[%s2288_s0 + $0xa8] ss:$16 sps:$4 sm:$0xff]  }
   0x9   :  { %384 = vmatprep.subr.bf16.mxu0 %v1756_v9  ;;  %497 = vmatprep.subr.bf16.mxu1 %v1758_v10  ;;  %v1780_v25 = vld [vmem:[%s2288_s0 + $0xc4] ss:$16 sps:$4 sm:$0xff]   ;;  %v1782_v26 = vld [vmem:[%s2288_s0 + $0xcc] ss:$16 sps:$4 sm:$0xff]   ;;  %v1784_v27 = vld [vmem:[%s2288_s0 + $0xc0] ss:$16 sps:$4 sm:$0xff]  }
   0xa   :  { %v1785_v28 = vld [vmem:[%s2288_s0 + $0xc8] ss:$16 sps:$4 sm:$0xff]   ;;  %v1786_v29 = vld [vmem:[%s2288_s0 + $0xe4] ss:$16 sps:$4 sm:$0xff]   ;;  %v1788_v31 = vld [vmem:[%s2288_s0 + $0xec] ss:$16 sps:$4 sm:$0xff]  }
   0xb   :  { %v76_v30 = vld [vmem:[%s2290_s2] sm:$0xff]  ;;  %v78_v32 = vld [vmem:[%s2290_s2 + $0x10] sm:$0xff]  ;;  %v77_v33 = vld [vmem:[%s2290_s2 + $0x8] sm:$0xff] }
   0xc   :  { %385 = vmatpush1.bf16.msra.mxu0 %v1760_v11  ;;  %498 = vmatpush1.bf16.msra.mxu1 %v1761_v12  ;;  %v1790_v34 = vld [vmem:[%s2288_s0 + $0xe0] ss:$16 sps:$4 sm:$0xff]   ;;  %v1791_v35 = vld [vmem:[%s2288_s0 + $0xe8] ss:$16 sps:$4 sm:$0xff]  }
   0xd   :  { %386 = vmatprep.subr.bf16.mxu0 %v1762_v13  ;;  %499 = vmatprep.subr.bf16.mxu1 %v1764_v14  ;;  %v79_v36 = vld [vmem:[%s2290_s2 + $0x18] sm:$0xff]  ;;  %v1792_v37 = vld [vmem:[%s2289_s1] sm:$0xff]   ;;  %v81_v39 = vld [vmem:[%s2290_s2 + $0x28] sm:$0xff] }
   0xe   :  { %94 = vperm.xlu0 %1742, %v76_v30   ;;  %104 = vperm.xlu1 %1743, %v78_v32   ;;  %v80_v38 = vld [vmem:[%s2290_s2 + $0x20] sm:$0xff]  ;;  %v82_v40 = vld [vmem:[%s2290_s2 + $0x30] sm:$0xff]  ;;  %v83_v41 = vld [vmem:[%s2290_s2 + $0x38] sm:$0xff] }
   0xf   :  { %v1793_v42 = vld [vmem:[%s2289_s1 + $0x8] sm:$0xff]   ;;  %v84_v43 = vld [vmem:[%s2290_s2 + $0x40] sm:$0xff]  ;;  %v86_v45 = vld [vmem:[%s2290_s2 + $0x50] sm:$0xff] }
  0x10   :  { %387 = vmatpush1.bf16.msra.mxu0 %v1766_v15  ;;  %500 = vmatpush1.bf16.msra.mxu1 %v1767_v16  ;;  %v85_v44 = vld [vmem:[%s2290_s2 + $0x48] sm:$0xff]  ;;  %v87_v46 = vld [vmem:[%s2290_s2 + $0x58] sm:$0xff]  ;;  %v1794_v47 = vld [vmem:[%s2289_s1 + $0x10] sm:$0xff]  }
  0x11   :  { %388 = vmatprep.subr.bf16.mxu0 %v1768_v17  ;;  %501 = vmatprep.subr.bf16.mxu1 %v1770_v18  ;;  %v88_v48 = vld [vmem:[%s2290_s2 + $0x60] sm:$0xff]  ;;  %v89_v49 = vld [vmem:[%s2290_s2 + $0x68] sm:$0xff]  ;;  %v90_v50 = vld [vmem:[%s2290_s2 + $0x70] sm:$0xff] }
  0x12   :  { %99 = vperm.xlu0 %1742, %v77_v33   ;;  %109 = vperm.xlu1 %1743, %v79_v36  }
  0x14   :  { %389 = vmatpush1.bf16.msra.mxu0 %v1772_v19  ;;  %502 = vmatpush1.bf16.msra.mxu1 %v1773_v20 }
  0x15   :  { %390 = vmatprep.subr.bf16.mxu0 %v1774_v21  ;;  %503 = vmatprep.subr.bf16.mxu1 %v1776_v22 }
  0x16   :  { %114 = vperm.xlu0 %1742, %v80_v38   ;;  %119 = vperm.xlu1 %1743, %v81_v39  }
  0x18   :  { %391 = vmatpush1.bf16.msra.mxu0 %v1778_v23  ;;  %504 = vmatpush1.bf16.msra.mxu1 %v1779_v24 }
  0x19   :  { %392 = vmatprep.subr.bf16.mxu0 %v1780_v25  ;;  %505 = vmatprep.subr.bf16.mxu1 %v1782_v26 }
  0x1a   :  { %124 = vperm.xlu0 %1742, %v82_v40   ;;  %129 = vperm.xlu1 %1743, %v83_v41  }
  0x1c   :  { %393 = vmatpush1.bf16.msra.mxu0 %v1784_v27  ;;  %506 = vmatpush1.bf16.msra.mxu1 %v1785_v28 }
  0x1d   :  { %394 = vmatprep.subr.bf16.mxu0 %v1786_v29  ;;  %507 = vmatprep.subr.bf16.mxu1 %v1788_v31 }
  0x1e   :  { %134 = vperm.xlu0 %1742, %v84_v43   ;;  %139 = vperm.xlu1 %1743, %v85_v44  }
  0x20   :  { %395 = vmatpush1.bf16.msra.mxu0 %v1790_v34  ;;  %508 = vmatpush1.bf16.msra.mxu1 %v1791_v35 }
  0x22   :  { %144 = vperm.xlu0 %1742, %v86_v45   ;;  %149 = vperm.xlu1 %1743, %v87_v46  }
  0x23   :  { %413 = vmatmul.mubr.bf16.vlgmr.msra.gmra.mrb[0].mxu0 %v1792_v37  ;;  %526 = vmatmul.mubr.bf16.vlgmr.msra.gmra.mrb[0].mxu1 %v1792_v37 }
  0x24   :  { %422 = vmatprep.mubr.bf16.mxu0 %v1880_v2  ;;  %535 = vmatprep.mubr.bf16.mxu1 %v1880_v2 }
  0x26   :  { %154 = vperm.xlu0 %1742, %v88_v48  }
  0x2b   :  { %423 = vmatmul.mubr.bf16.gmra.mrb[4].mxu0 %v1793_v42  ;;  %536 = vmatmul.mubr.bf16.gmra.mrb[4].mxu1 %v1793_v42 }
  0x2c   :  { %432 = vmatprep.mubr.bf16.mxu0 %v1880_v2  ;;  %545 = vmatprep.mubr.bf16.mxu1 %v1880_v2 }
  0x33   :  { %433 = vmatmul.mubr.bf16.gmra.mrb[8].mxu0 %v1794_v47  ;;  %546 = vmatmul.mubr.bf16.gmra.mrb[8].mxu1 %v1794_v47 }
  0x34   :  { %12 = vsyncpa [#allocation3], 0  ;;  %442 = vmatprep.mubr.bf16.mxu0 %v1880_v2  ;;  %555 = vmatprep.mubr.bf16.mxu1 %v1880_v2  ;;  %v91_v51 = vld [vmem:[%s2290_s2 + $0x78] sm:$0xff]  ;;  %v718_v53 = vld [vmem:[%s2292_s4] sm:$0xff] }
  0x35   :  { %159 = vperm.xlu1 %1743, %v89_v49   ;;  %164 = vperm.xlu0 %1742, %v90_v50   ;;  %v1795_v52 = vld [vmem:[%s2289_s1 + $0x18] sm:$0xff]   ;;  %v719_v54 = vld [vmem:[%s2292_s4 + $0x8] sm:$0xff]  ;;  %v720_v55 = vld [vmem:[%s2292_s4 + $0x10] sm:$0xff] }
  0x36   :  { %v721_v56 = vld [vmem:[%s2292_s4 + $0x18] sm:$0xff]  ;;  %v1796_v57 = vld [vmem:[%s2289_s1 + $0x20] sm:$0xff]   ;;  %v723_v59 = vld [vmem:[%s2292_s4 + $0x28] sm:$0xff] }
  0x37   :  { %v722_v58 = vld [vmem:[%s2292_s4 + $0x20] sm:$0xff]  ;;  %v724_v60 = vld [vmem:[%s2292_s4 + $0x30] sm:$0xff]  ;;  %v725_v61 = vld [vmem:[%s2292_s4 + $0x38] sm:$0xff] }
  0x38   :  { %v1797_v62 = vld [vmem:[%s2289_s1 + $0x28] sm:$0xff]   ;;  %v726_v63 = vld [vmem:[%s2292_s4 + $0x40] sm:$0xff]  ;;  %v728_v1 = vld [vmem:[%s2292_s4 + $0x50] sm:$0xff] }
  0x39   :  { %169 = vperm.xlu1 %1743, %v91_v51   ;;  %736 = vperm.xlu0 %1742, %v718_v53   ;;  %v727_v0 = vld [vmem:[%s2292_s4 + $0x48] sm:$0xff]  ;;  %v729_v3 = vld [vmem:[%s2292_s4 + $0x58] sm:$0xff]  ;;  %v1798_v4 = vld [vmem:[%s2289_s1 + $0x30] sm:$0xff]  }
  0x3a   :  { %v730_v5 = vld [vmem:[%s2292_s4 + $0x60] sm:$0xff]  ;;  %v731_v6 = vld [vmem:[%s2292_s4 + $0x68] sm:$0xff]  ;;  %v732_v7 = vld [vmem:[%s2292_s4 + $0x70] sm:$0xff] }
  0x3b   :  { %443 = vmatmul.mubr.bf16.gmra.mrb[12].mxu0 %v1795_v52  ;;  %556 = vmatmul.mubr.bf16.gmra.mrb[12].mxu1 %v1795_v52  ;;  %v733_v8 = vld [vmem:[%s2292_s4 + $0x78] sm:$0xff]  ;;  %v1200_v10 = vld [vmem:[%s2294_s6] sm:$0xff] }
  0x3c   :  { %452 = vmatprep.mubr.bf16.mxu0 %v1880_v2  ;;  %565 = vmatprep.mubr.bf16.mxu1 %v1880_v2  ;;  %v1799_v9 = vld [vmem:[%s2289_s1 + $0x38] sm:$0xff]  }
  0x3d   :  { %741 = vperm.xlu1 %1743, %v719_v54   ;;  %746 = vperm.xlu0 %1742, %v720_v55  }
  0x41   :  { %751 = vperm.xlu1 %1743, %v721_v56   ;;  %756 = vperm.xlu0 %1742, %v722_v58  }
  0x43   :  { %453 = vmatmul.mubr.bf16.gmra.mrb[16].mxu0 %v1796_v57  ;;  %566 = vmatmul.mubr.bf16.gmra.mrb[16].mxu1 %v1796_v57 }
  0x44   :  { %462 = vmatprep.mubr.bf16.mxu0 %v1880_v2  ;;  %575 = vmatprep.mubr.bf16.mxu1 %v1880_v2 }
  0x45   :  { %761 = vperm.xlu1 %1743, %v723_v59   ;;  %766 = vperm.xlu0 %1742, %v724_v60  }
  0x49   :  { %771 = vperm.xlu1 %1743, %v725_v61   ;;  %776 = vperm.xlu0 %1742, %v726_v63  }
  0x4b   :  { %463 = vmatmul.mubr.bf16.gmra.mrb[20].mxu0 %v1797_v62  ;;  %576 = vmatmul.mubr.bf16.gmra.mrb[20].mxu1 %v1797_v62 }
  0x4c   :  { %472 = vmatprep.mubr.bf16.mxu0 %v1880_v2  ;;  %585 = vmatprep.mubr.bf16.mxu1 %v1880_v2 }
  0x4d   :  { %781 = vperm.xlu1 %1743, %v727_v0   ;;  %786 = vperm.xlu0 %1742, %v728_v1  }
  0x51   :  { %791 = vperm.xlu1 %1743, %v729_v3   ;;  %796 = vperm.xlu0 %1742, %v730_v5  }
  0x53   :  { %473 = vmatmul.mubr.bf16.gmra.mrb[24].mxu0 %v1798_v4  ;;  %586 = vmatmul.mubr.bf16.gmra.mrb[24].mxu1 %v1798_v4 }
  0x54   :  { %482 = vmatprep.mubr.bf16.mxu0 %v1880_v2  ;;  %595 = vmatprep.mubr.bf16.mxu1 %v1880_v2 }
  0x55   :  { %801 = vperm.xlu1 %1743, %v731_v6   ;;  %806 = vperm.xlu0 %1742, %v732_v7  }
  0x59   :  { %811 = vperm.xlu1 %1743, %v733_v8   ;;  %1218 = vperm.xlu0 %1742, %v1200_v10  }
  0x5b   :  { %483 = vmatmul.mubr.bf16.gmra.mrb[28].mxu0 %v1799_v9  ;;  %596 = vmatmul.mubr.bf16.gmra.mrb[28].mxu1 %v1799_v9 }
  0x5c   :  { %894 = vmatprep.mubr.bf16.mxu0 %v1880_v2  ;;  %1007 = vmatprep.mubr.bf16.mxu1 %v1880_v2 }
  0x8d   :  { %v95_v11 = vpop.permute.xlu0 %94  ;;  %v105_v13 = vpop.permute.xlu1 %104 }
  0x91   :  { %v100_v12 = vpop.permute.xlu0 %99  ;;  %v110_v38 = vpop.permute.xlu1 %109 }
  0x95   :  { %v115_v4 = vpop.permute.xlu0 %114  ;;  %v120_v5 = vpop.permute.xlu1 %119 }
  0xf6   :  { %v414_v14 = vpop.f32.mrb[0].mxu0  ;;  %v527_v15 = vpop.f32.mrb[0].mxu1 }
  0xf7   :  { %v415_v16 = vadd.f32 %v414_v14, %v95_v11  ;;  %v528_v17 = vadd.f32 %v527_v15, %v95_v11  ;;  %v416_v18 = vpop.f32.mrb[1].mxu0  ;;  %v529_v19 = vpop.f32.mrb[1].mxu1 }
  0xf8   :  { %v417_v20 = vadd.f32 %v416_v18, %v95_v11  ;;  %v530_v21 = vadd.f32 %v529_v19, %v95_v11  ;;  %v418_v22 = vpop.f32.mrb[2].mxu0  ;;  %v531_v23 = vpop.f32.mrb[2].mxu1 }
  0xf9   :  { %v419_v24 = vadd.f32 %v418_v22, %v100_v12  ;;  %v532_v25 = vadd.f32 %v531_v23, %v100_v12  ;;  %v420_v26 = vpop.f32.mrb[3].mxu0  ;;  %v533_v27 = vpop.f32.mrb[3].mxu1  ;;  %v606_v30 = vmax.f32 %v415_v16, 0.0  ;;  %v608_v31 = vmax.f32 %v528_v17, 0.0 }
  0xfa   :  { %v421_v28 = vadd.f32 %v420_v26, %v100_v12  ;;  %v534_v29 = vadd.f32 %v533_v27, %v100_v12  ;;  %v607_v34 = vmax.f32 %v417_v20, 0.0  ;;  %v609_v35 = vmax.f32 %v530_v21, 0.0 }
  0xfb   :  { %v610_v32 = vmax.f32 %v419_v24, 0.0  ;;  %v612_v33 = vmax.f32 %v532_v25, 0.0 }
  0xfc   :  { %v611_v36 = vmax.f32 %v421_v28, 0.0  ;;  %v613_v37 = vmax.f32 %v534_v29, 0.0 }
  0xfd   :  { %v670_v39 = vpack.c.bf16 %v610_v32, %v606_v30  ;;  %v672_v40 = vpack.c.bf16 %v612_v33, %v608_v31 }
  0xfe   :  { %v671_v41 = vpack.c.bf16 %v611_v36, %v607_v34  ;;  %v673_v42 = vpack.c.bf16 %v613_v37, %v609_v35  ;;  %v424_v43 = vpop.f32.mrb[4].mxu0  ;;  %v537_v44 = vpop.f32.mrb[4].mxu1 }
  0xff   :  { %v425_v45 = vadd.f32 %v424_v43, %v105_v13  ;;  %v538_v46 = vadd.f32 %v537_v44, %v105_v13  ;;  %v426_v47 = vpop.f32.mrb[5].mxu0  ;;  %v539_v48 = vpop.f32.mrb[5].mxu1 }
 0x100   :  { %v427_v49 = vadd.f32 %v426_v47, %v105_v13  ;;  %v540_v50 = vadd.f32 %v539_v48, %v105_v13  ;;  %v428_v51 = vpop.f32.mrb[6].mxu0  ;;  %v541_v52 = vpop.f32.mrb[6].mxu1  ;;  %862 = vmatprep.subr.bf16.mxu0 %v671_v41  ;;  %975 = vmatprep.subr.bf16.mxu1 %v673_v42 }
 0x101   :  { %v429_v53 = vadd.f32 %v428_v51, %v110_v38  ;;  %v542_v54 = vadd.f32 %v541_v52, %v110_v38  ;;  %v430_v55 = vpop.f32.mrb[7].mxu0  ;;  %v543_v56 = vpop.f32.mrb[7].mxu1  ;;  %863 = vmatpush1.bf16.msra.mxu0 %v670_v39  ;;  %976 = vmatpush1.bf16.msra.mxu1 %v672_v40  ;;  %v614_v59 = vmax.f32 %v425_v45, 0.0  ;;  %v616_v60 = vmax.f32 %v538_v46, 0.0 }
 0x102   :  { %v431_v57 = vadd.f32 %v430_v55, %v110_v38  ;;  %v544_v58 = vadd.f32 %v543_v56, %v110_v38  ;;  %v615_v63 = vmax.f32 %v427_v49, 0.0  ;;  %v617_v0 = vmax.f32 %v540_v50, 0.0  ;;  %v125_v34 = vpop.permute.xlu0 %124  ;;  %v130_v35 = vpop.permute.xlu1 %129 }
 0x103   :  { %v618_v61 = vmax.f32 %v429_v53, 0.0  ;;  %v620_v62 = vmax.f32 %v542_v54, 0.0 }
 0x104   :  { %v619_v1 = vmax.f32 %v431_v57, 0.0  ;;  %v621_v3 = vmax.f32 %v544_v58, 0.0 }
 0x105   :  { %v674_v6 = vpack.c.bf16 %v618_v61, %v614_v59  ;;  %v676_v7 = vpack.c.bf16 %v620_v62, %v616_v60 }
 0x106   :  { %v675_v8 = vpack.c.bf16 %v619_v1, %v615_v63  ;;  %v677_v9 = vpack.c.bf16 %v621_v3, %v617_v0  ;;  %v434_v10 = vpop.f32.mrb[8].mxu0  ;;  %v547_v11 = vpop.f32.mrb[8].mxu1 }
 0x107   :  { %v435_v12 = vadd.f32 %v434_v10, %v115_v4  ;;  %v548_v13 = vadd.f32 %v547_v11, %v115_v4  ;;  %v436_v14 = vpop.f32.mrb[9].mxu0  ;;  %v549_v15 = vpop.f32.mrb[9].mxu1 }
 0x108   :  { %v437_v16 = vadd.f32 %v436_v14, %v115_v4  ;;  %v550_v17 = vadd.f32 %v549_v15, %v115_v4  ;;  %v438_v18 = vpop.f32.mrb[10].mxu0  ;;  %v551_v19 = vpop.f32.mrb[10].mxu1  ;;  %864 = vmatprep.subr.bf16.mxu0 %v675_v8  ;;  %977 = vmatprep.subr.bf16.mxu1 %v677_v9 }
 0x109   :  { %v439_v20 = vadd.f32 %v438_v18, %v120_v5  ;;  %v552_v21 = vadd.f32 %v551_v19, %v120_v5  ;;  %v440_v22 = vpop.f32.mrb[11].mxu0  ;;  %v553_v23 = vpop.f32.mrb[11].mxu1  ;;  %865 = vmatpush1.bf16.msra.mxu0 %v674_v6  ;;  %978 = vmatpush1.bf16.msra.mxu1 %v676_v7  ;;  %v622_v26 = vmax.f32 %v435_v12, 0.0  ;;  %v624_v27 = vmax.f32 %v548_v13, 0.0 }
 0x10a   :  { %v441_v24 = vadd.f32 %v440_v22, %v120_v5  ;;  %v554_v25 = vadd.f32 %v553_v23, %v120_v5  ;;  %v623_v30 = vmax.f32 %v437_v16, 0.0  ;;  %v625_v31 = vmax.f32 %v550_v17, 0.0  ;;  %v135_v0 = vpop.permute.xlu0 %134  ;;  %v140_v1 = vpop.permute.xlu1 %139 }
 0x10b   :  { %v626_v28 = vmax.f32 %v439_v20, 0.0  ;;  %v628_v29 = vmax.f32 %v552_v21, 0.0 }
 0x10c   :  { %v627_v32 = vmax.f32 %v441_v24, 0.0  ;;  %v629_v33 = vmax.f32 %v554_v25, 0.0 }
 0x10d   :  { %v678_v36 = vpack.c.bf16 %v626_v28, %v622_v26  ;;  %v680_v37 = vpack.c.bf16 %v628_v29, %v624_v27 }
 0x10e   :  { %v679_v38 = vpack.c.bf16 %v627_v32, %v623_v30  ;;  %v681_v39 = vpack.c.bf16 %v629_v33, %v625_v31  ;;  %v444_v40 = vpop.f32.mrb[12].mxu0  ;;  %v557_v41 = vpop.f32.mrb[12].mxu1 }
 0x10f   :  { %v445_v42 = vadd.f32 %v444_v40, %v125_v34  ;;  %v558_v43 = vadd.f32 %v557_v41, %v125_v34  ;;  %v446_v44 = vpop.f32.mrb[13].mxu0  ;;  %v559_v45 = vpop.f32.mrb[13].mxu1 }
 0x110   :  { %v447_v46 = vadd.f32 %v446_v44, %v125_v34  ;;  %v560_v47 = vadd.f32 %v559_v45, %v125_v34  ;;  %v448_v48 = vpop.f32.mrb[14].mxu0  ;;  %v561_v49 = vpop.f32.mrb[14].mxu1  ;;  %866 = vmatprep.subr.bf16.mxu0 %v679_v38  ;;  %979 = vmatprep.subr.bf16.mxu1 %v681_v39 }
 0x111   :  { %v449_v50 = vadd.f32 %v448_v48, %v130_v35  ;;  %v562_v51 = vadd.f32 %v561_v49, %v130_v35  ;;  %v450_v52 = vpop.f32.mrb[15].mxu0  ;;  %v563_v53 = vpop.f32.mrb[15].mxu1  ;;  %867 = vmatpush1.bf16.msra.mxu0 %v678_v36  ;;  %980 = vmatpush1.bf16.msra.mxu1 %v680_v37  ;;  %v630_v56 = vmax.f32 %v445_v42, 0.0  ;;  %v632_v57 = vmax.f32 %v558_v43, 0.0 }
 0x112   :  { %v451_v54 = vadd.f32 %v450_v52, %v130_v35  ;;  %v564_v55 = vadd.f32 %v563_v53, %v130_v35  ;;  %v631_v60 = vmax.f32 %v447_v46, 0.0  ;;  %v633_v61 = vmax.f32 %v560_v47, 0.0  ;;  %v145_v31 = vpop.permute.xlu0 %144  ;;  %v150_v32 = vpop.permute.xlu1 %149 }
 0x113   :  { %v634_v58 = vmax.f32 %v449_v50, 0.0  ;;  %v636_v59 = vmax.f32 %v562_v51, 0.0 }
 0x114   :  { %v635_v62 = vmax.f32 %v451_v54, 0.0  ;;  %v637_v63 = vmax.f32 %v564_v55, 0.0 }
 0x115   :  { %v682_v3 = vpack.c.bf16 %v634_v58, %v630_v56  ;;  %v684_v4 = vpack.c.bf16 %v636_v59, %v632_v57 }
 0x116   :  { %v683_v5 = vpack.c.bf16 %v635_v62, %v631_v60  ;;  %v685_v6 = vpack.c.bf16 %v637_v63, %v633_v61  ;;  %v454_v7 = vpop.f32.mrb[16].mxu0  ;;  %v567_v8 = vpop.f32.mrb[16].mxu1 }
 0x117   :  { %v455_v9 = vadd.f32 %v454_v7, %v135_v0  ;;  %v568_v10 = vadd.f32 %v567_v8, %v135_v0  ;;  %v456_v11 = vpop.f32.mrb[17].mxu0  ;;  %v569_v12 = vpop.f32.mrb[17].mxu1 }
 0x118   :  { %v457_v13 = vadd.f32 %v456_v11, %v135_v0  ;;  %v570_v14 = vadd.f32 %v569_v12, %v135_v0  ;;  %v458_v15 = vpop.f32.mrb[18].mxu0  ;;  %v571_v16 = vpop.f32.mrb[18].mxu1  ;;  %868 = vmatprep.subr.bf16.mxu0 %v683_v5  ;;  %981 = vmatprep.subr.bf16.mxu1 %v685_v6 }
 0x119   :  { %v459_v17 = vadd.f32 %v458_v15, %v140_v1  ;;  %v572_v18 = vadd.f32 %v571_v16, %v140_v1  ;;  %v460_v19 = vpop.f32.mrb[19].mxu0  ;;  %v573_v20 = vpop.f32.mrb[19].mxu1  ;;  %869 = vmatpush1.bf16.msra.mxu0 %v682_v3  ;;  %982 = vmatpush1.bf16.msra.mxu1 %v684_v4  ;;  %v638_v23 = vmax.f32 %v455_v9, 0.0  ;;  %v640_v24 = vmax.f32 %v568_v10, 0.0 }
 0x11a   :  { %v461_v21 = vadd.f32 %v460_v19, %v140_v1  ;;  %v574_v22 = vadd.f32 %v573_v20, %v140_v1  ;;  %v639_v27 = vmax.f32 %v457_v13, 0.0  ;;  %v641_v28 = vmax.f32 %v570_v14, 0.0  ;;  %v155_v61 = vpop.permute.xlu0 %154  ;;  %v160_v62 = vpop.permute.xlu1 %159 }
 0x11b   :  { %v642_v25 = vmax.f32 %v459_v17, 0.0  ;;  %v644_v26 = vmax.f32 %v572_v18, 0.0 }
 0x11c   :  { %v643_v29 = vmax.f32 %v461_v21, 0.0  ;;  %v645_v30 = vmax.f32 %v574_v22, 0.0 }
 0x11d   :  { %v686_v33 = vpack.c.bf16 %v642_v25, %v638_v23  ;;  %v688_v34 = vpack.c.bf16 %v644_v26, %v640_v24 }
 0x11e   :  { %v687_v35 = vpack.c.bf16 %v643_v29, %v639_v27  ;;  %v689_v36 = vpack.c.bf16 %v645_v30, %v641_v28  ;;  %v464_v37 = vpop.f32.mrb[20].mxu0  ;;  %v577_v38 = vpop.f32.mrb[20].mxu1 }
 0x11f   :  { %v465_v39 = vadd.f32 %v464_v37, %v145_v31  ;;  %v578_v40 = vadd.f32 %v577_v38, %v145_v31  ;;  %v466_v41 = vpop.f32.mrb[21].mxu0  ;;  %v579_v42 = vpop.f32.mrb[21].mxu1 }
 0x120   :  { %v467_v43 = vadd.f32 %v466_v41, %v145_v31  ;;  %v580_v44 = vadd.f32 %v579_v42, %v145_v31  ;;  %v468_v45 = vpop.f32.mrb[22].mxu0  ;;  %v581_v46 = vpop.f32.mrb[22].mxu1  ;;  %870 = vmatprep.subr.bf16.mxu0 %v687_v35  ;;  %983 = vmatprep.subr.bf16.mxu1 %v689_v36 }
 0x121   :  { %v469_v47 = vadd.f32 %v468_v45, %v150_v32  ;;  %v582_v48 = vadd.f32 %v581_v46, %v150_v32  ;;  %v470_v49 = vpop.f32.mrb[23].mxu0  ;;  %v583_v50 = vpop.f32.mrb[23].mxu1  ;;  %871 = vmatpush1.bf16.msra.mxu0 %v686_v33  ;;  %984 = vmatpush1.bf16.msra.mxu1 %v688_v34  ;;  %v646_v53 = vmax.f32 %v465_v39, 0.0  ;;  %v648_v54 = vmax.f32 %v578_v40, 0.0 }
 0x122   :  { %v471_v51 = vadd.f32 %v470_v49, %v150_v32  ;;  %v584_v52 = vadd.f32 %v583_v50, %v150_v32  ;;  %v647_v57 = vmax.f32 %v467_v43, 0.0  ;;  %v649_v58 = vmax.f32 %v580_v44, 0.0  ;;  %v165_v28 = vpop.permute.xlu0 %164  ;;  %v170_v29 = vpop.permute.xlu1 %169 }
 0x123   :  { %v650_v55 = vmax.f32 %v469_v47, 0.0  ;;  %v652_v56 = vmax.f32 %v582_v48, 0.0 }
 0x124   :  { %v651_v59 = vmax.f32 %v471_v51, 0.0  ;;  %v653_v60 = vmax.f32 %v584_v52, 0.0 }
 0x125   :  { %v690_v63 = vpack.c.bf16 %v650_v55, %v646_v53  ;;  %v692_v0 = vpack.c.bf16 %v652_v56, %v648_v54 }
 0x126   :  { %v691_v1 = vpack.c.bf16 %v651_v59, %v647_v57  ;;  %v693_v3 = vpack.c.bf16 %v653_v60, %v649_v58  ;;  %v474_v4 = vpop.f32.mrb[24].mxu0  ;;  %v587_v5 = vpop.f32.mrb[24].mxu1 }
 0x127   :  { %v475_v6 = vadd.f32 %v474_v4, %v155_v61  ;;  %v588_v7 = vadd.f32 %v587_v5, %v155_v61  ;;  %v476_v8 = vpop.f32.mrb[25].mxu0  ;;  %v589_v9 = vpop.f32.mrb[25].mxu1  ;;  %v1805_v4 = vld [vmem:[%s2291_s3 + $0x28] sm:$0xff]   ;;  %v1806_v5 = vld [vmem:[%s2291_s3 + $0x30] sm:$0xff]  }
 0x128   :  { %v477_v10 = vadd.f32 %v476_v8, %v155_v61  ;;  %v590_v11 = vadd.f32 %v589_v9, %v155_v61  ;;  %v478_v12 = vpop.f32.mrb[26].mxu0  ;;  %v591_v13 = vpop.f32.mrb[26].mxu1  ;;  %872 = vmatprep.subr.bf16.mxu0 %v691_v1  ;;  %985 = vmatprep.subr.bf16.mxu1 %v693_v3  ;;  %v1803_v1 = vld [vmem:[%s2291_s3 + $0x18] sm:$0xff]   ;;  %v1804_v3 = vld [vmem:[%s2291_s3 + $0x20] sm:$0xff]  }
 0x129   :  { %v479_v14 = vadd.f32 %v478_v12, %v160_v62  ;;  %v592_v15 = vadd.f32 %v591_v13, %v160_v62  ;;  %v480_v16 = vpop.f32.mrb[27].mxu0  ;;  %v593_v17 = vpop.f32.mrb[27].mxu1  ;;  %873 = vmatpush1.bf16.msra.mxu0 %v690_v63  ;;  %986 = vmatpush1.bf16.msra.mxu1 %v692_v0  ;;  %v654_v20 = vmax.f32 %v475_v6, 0.0  ;;  %v656_v21 = vmax.f32 %v588_v7, 0.0  ;;  %v1801_v63 = vld [vmem:[%s2291_s3 + $0x8] sm:$0xff]   ;;  %v1802_v0 = vld [vmem:[%s2291_s3 + $0x10] sm:$0xff]  }
 0x12a   :  { %v481_v18 = vadd.f32 %v480_v16, %v160_v62  ;;  %v594_v19 = vadd.f32 %v593_v17, %v160_v62  ;;  %v655_v24 = vmax.f32 %v477_v10, 0.0  ;;  %v657_v25 = vmax.f32 %v590_v11, 0.0  ;;  %v1800_v62 = vld [vmem:[%s2291_s3] sm:$0xff]   ;;  %v1807_v6 = vld [vmem:[%s2291_s3 + $0x38] sm:$0xff]   ;;  %v737_v7 = vpop.permute.xlu0 %736  ;;  %v742_v8 = vpop.permute.xlu1 %741 }
 0x12b   :  { %v658_v22 = vmax.f32 %v479_v14, 0.0  ;;  %v660_v23 = vmax.f32 %v592_v15, 0.0 }
 0x12c   :  { %v659_v26 = vmax.f32 %v481_v18, 0.0  ;;  %v661_v27 = vmax.f32 %v594_v19, 0.0 }
 0x12d   :  { %v694_v30 = vpack.c.bf16 %v658_v22, %v654_v20  ;;  %v696_v31 = vpack.c.bf16 %v660_v23, %v656_v21 }
 0x12e   :  { %v695_v32 = vpack.c.bf16 %v659_v26, %v655_v24  ;;  %v697_v33 = vpack.c.bf16 %v661_v27, %v657_v25  ;;  %v484_v34 = vpop.f32.mrb[28].mxu0  ;;  %v597_v35 = vpop.f32.mrb[28].mxu1 }
 0x12f   :  { %v485_v36 = vadd.f32 %v484_v34, %v165_v28  ;;  %v598_v37 = vadd.f32 %v597_v35, %v165_v28  ;;  %v486_v38 = vpop.f32.mrb[29].mxu0  ;;  %v599_v39 = vpop.f32.mrb[29].mxu1 }
 0x130   :  { %v487_v40 = vadd.f32 %v486_v38, %v165_v28  ;;  %v600_v41 = vadd.f32 %v599_v39, %v165_v28  ;;  %v488_v42 = vpop.f32.mrb[30].mxu0  ;;  %v601_v43 = vpop.f32.mrb[30].mxu1  ;;  %874 = vmatprep.subr.bf16.mxu0 %v695_v32  ;;  %987 = vmatprep.subr.bf16.mxu1 %v697_v33 }
 0x131   :  { %v489_v44 = vadd.f32 %v488_v42, %v170_v29  ;;  %v602_v45 = vadd.f32 %v601_v43, %v170_v29  ;;  %v490_v46 = vpop.f32.mrb[31].mxu0  ;;  %v603_v47 = vpop.f32.mrb[31].mxu1  ;;  %875 = vmatpush1.bf16.msra.mxu0 %v694_v30  ;;  %988 = vmatpush1.bf16.msra.mxu1 %v696_v31  ;;  %v662_v50 = vmax.f32 %v485_v36, 0.0  ;;  %v664_v51 = vmax.f32 %v598_v37, 0.0 }
 0x132   :  { %v491_v48 = vadd.f32 %v490_v46, %v170_v29  ;;  %v604_v49 = vadd.f32 %v603_v47, %v170_v29  ;;  %v663_v54 = vmax.f32 %v487_v40, 0.0  ;;  %v665_v55 = vmax.f32 %v600_v41, 0.0  ;;  %v747_v33 = vpop.permute.xlu0 %746  ;;  %v752_v34 = vpop.permute.xlu1 %751 }
 0x133   :  { %v666_v52 = vmax.f32 %v489_v44, 0.0  ;;  %v668_v53 = vmax.f32 %v602_v45, 0.0 }
 0x134   :  { %v667_v56 = vmax.f32 %v491_v48, 0.0  ;;  %v669_v57 = vmax.f32 %v604_v49, 0.0 }
 0x135   :  { %v698_v58 = vpack.c.bf16 %v666_v52, %v662_v50  ;;  %v700_v59 = vpack.c.bf16 %v668_v53, %v664_v51 }
 0x136   :  { %v699_v60 = vpack.c.bf16 %v667_v56, %v663_v54  ;;  %v701_v61 = vpack.c.bf16 %v669_v57, %v665_v55 }
 0x138   :  { %876 = vmatprep.subr.bf16.mxu0 %v699_v60  ;;  %989 = vmatprep.subr.bf16.mxu1 %v701_v61 }
 0x139   :  { %877 = vmatpush1.bf16.msra.mxu0 %v698_v58  ;;  %990 = vmatpush1.bf16.msra.mxu1 %v700_v59 }
 0x13c   :  { %895 = vmatmul.mubr.bf16.vlgmr.msra.gmra.mrb[32].mxu0 %v1800_v62  ;;  %1008 = vmatmul.mubr.bf16.vlgmr.msra.gmra.mrb[32].mxu1 %v1800_v62 }
 0x13d   :  { %904 = vmatprep.mubr.bf16.mxu0 %v1880_v2  ;;  %1017 = vmatprep.mubr.bf16.mxu1 %v1880_v2 }
 0x144   :  { %905 = vmatmul.mubr.bf16.gmra.mrb[36].mxu0 %v1801_v63  ;;  %1018 = vmatmul.mubr.bf16.gmra.mrb[36].mxu1 %v1801_v63  ;;  %v757_v63 = vpop.permute.xlu0 %756 }
 0x145   :  { %914 = vmatprep.mubr.bf16.mxu0 %v1880_v2  ;;  %1027 = vmatprep.mubr.bf16.mxu1 %v1880_v2 }
 0x14c   :  { %915 = vmatmul.mubr.bf16.gmra.mrb[40].mxu0 %v1802_v0  ;;  %1028 = vmatmul.mubr.bf16.gmra.mrb[40].mxu1 %v1802_v0  ;;  %v762_v0 = vpop.permute.xlu1 %761 }
 0x14d   :  { %924 = vmatprep.mubr.bf16.mxu0 %v1880_v2  ;;  %1037 = vmatprep.mubr.bf16.mxu1 %v1880_v2 }
 0x154   :  { %925 = vmatmul.mubr.bf16.gmra.mrb[44].mxu0 %v1803_v1  ;;  %1038 = vmatmul.mubr.bf16.gmra.mrb[44].mxu1 %v1803_v1 }
 0x155   :  { %934 = vmatprep.mubr.bf16.mxu0 %v1880_v2  ;;  %1047 = vmatprep.mubr.bf16.mxu1 %v1880_v2 }
 0x15c   :  { %935 = vmatmul.mubr.bf16.gmra.mrb[48].mxu0 %v1804_v3  ;;  %1048 = vmatmul.mubr.bf16.gmra.mrb[48].mxu1 %v1804_v3 }
 0x15d   :  { %944 = vmatprep.mubr.bf16.mxu0 %v1880_v2  ;;  %1057 = vmatprep.mubr.bf16.mxu1 %v1880_v2 }
 0x164   :  { %945 = vmatmul.mubr.bf16.gmra.mrb[52].mxu0 %v1805_v4  ;;  %1058 = vmatmul.mubr.bf16.gmra.mrb[52].mxu1 %v1805_v4 }
 0x165   :  { %954 = vmatprep.mubr.bf16.mxu0 %v1880_v2  ;;  %1067 = vmatprep.mubr.bf16.mxu1 %v1880_v2 }
 0x16c   :  { %955 = vmatmul.mubr.bf16.gmra.mrb[56].mxu0 %v1806_v5  ;;  %1068 = vmatmul.mubr.bf16.gmra.mrb[56].mxu1 %v1806_v5 }
 0x16d   :  { %964 = vmatprep.mubr.bf16.mxu0 %v1880_v2  ;;  %1077 = vmatprep.mubr.bf16.mxu1 %v1880_v2 }
 0x174   :  { %965 = vmatmul.mubr.bf16.gmra.mrb[60].mxu0 %v1807_v6  ;;  %1078 = vmatmul.mubr.bf16.gmra.mrb[60].mxu1 %v1807_v6 }
 0x175   :  { %1361 = vmatprep.mubr.bf16.mxu0 %v1880_v2  ;;  %1444 = vmatprep.mubr.bf16.mxu1 %v1880_v2 }
 0x20f   :  { %v896_v9 = vpop.f32.mrb[32].mxu0  ;;  %v1009_v10 = vpop.f32.mrb[32].mxu1 }
 0x210   :  { %v897_v11 = vadd.f32 %v896_v9, %v737_v7  ;;  %v1010_v12 = vadd.f32 %v1009_v10, %v737_v7  ;;  %v898_v13 = vpop.f32.mrb[33].mxu0  ;;  %v1011_v14 = vpop.f32.mrb[33].mxu1 }
 0x211   :  { %v899_v15 = vadd.f32 %v898_v13, %v737_v7  ;;  %v1012_v16 = vadd.f32 %v1011_v14, %v737_v7  ;;  %v900_v17 = vpop.f32.mrb[34].mxu0  ;;  %v1013_v18 = vpop.f32.mrb[34].mxu1 }
 0x212   :  { %v901_v19 = vadd.f32 %v900_v17, %v742_v8  ;;  %v1014_v20 = vadd.f32 %v1013_v18, %v742_v8  ;;  %v902_v21 = vpop.f32.mrb[35].mxu0  ;;  %v1015_v22 = vpop.f32.mrb[35].mxu1  ;;  %v1088_v25 = vmax.f32 %v897_v11, 0.0  ;;  %v1090_v26 = vmax.f32 %v1010_v12, 0.0 }
 0x213   :  { %v903_v23 = vadd.f32 %v902_v21, %v742_v8  ;;  %v1016_v24 = vadd.f32 %v1015_v22, %v742_v8  ;;  %v1089_v29 = vmax.f32 %v899_v15, 0.0  ;;  %v1091_v30 = vmax.f32 %v1012_v16, 0.0 }
 0x214   :  { %v1092_v27 = vmax.f32 %v901_v19, 0.0  ;;  %v1094_v28 = vmax.f32 %v1014_v20, 0.0 }
 0x215   :  { %v1093_v31 = vmax.f32 %v903_v23, 0.0  ;;  %v1095_v32 = vmax.f32 %v1016_v24, 0.0 }
 0x216   :  { %v1152_v35 = vpack.c.bf16 %v1092_v27, %v1088_v25  ;;  %v1154_v36 = vpack.c.bf16 %v1094_v28, %v1090_v26 }
 0x217   :  { %v1153_v37 = vpack.c.bf16 %v1093_v31, %v1089_v29  ;;  %v1155_v38 = vpack.c.bf16 %v1095_v32, %v1091_v30  ;;  %v906_v39 = vpop.f32.mrb[36].mxu0  ;;  %v1019_v40 = vpop.f32.mrb[36].mxu1 }
 0x218   :  { %v907_v41 = vadd.f32 %v906_v39, %v747_v33  ;;  %v1020_v42 = vadd.f32 %v1019_v40, %v747_v33  ;;  %v908_v43 = vpop.f32.mrb[37].mxu0  ;;  %v1021_v44 = vpop.f32.mrb[37].mxu1 }
 0x219   :  { %v909_v45 = vadd.f32 %v908_v43, %v747_v33  ;;  %v1022_v46 = vadd.f32 %v1021_v44, %v747_v33  ;;  %v910_v47 = vpop.f32.mrb[38].mxu0  ;;  %v1023_v48 = vpop.f32.mrb[38].mxu1  ;;  %1329 = vmatprep.subr.bf16.mxu0 %v1153_v37  ;;  %1412 = vmatprep.subr.bf16.mxu1 %v1155_v38 }
 0x21a   :  { %v911_v49 = vadd.f32 %v910_v47, %v752_v34  ;;  %v1024_v50 = vadd.f32 %v1023_v48, %v752_v34  ;;  %v912_v51 = vpop.f32.mrb[39].mxu0  ;;  %v1025_v52 = vpop.f32.mrb[39].mxu1  ;;  %1330 = vmatpush1.bf16.msra.mxu0 %v1152_v35  ;;  %1413 = vmatpush1.bf16.msra.mxu1 %v1154_v36  ;;  %v1096_v55 = vmax.f32 %v907_v41, 0.0  ;;  %v1098_v56 = vmax.f32 %v1020_v42, 0.0 }
 0x21b   :  { %v913_v53 = vadd.f32 %v912_v51, %v752_v34  ;;  %v1026_v54 = vadd.f32 %v1025_v52, %v752_v34  ;;  %v1097_v59 = vmax.f32 %v909_v45, 0.0  ;;  %v1099_v60 = vmax.f32 %v1022_v46, 0.0  ;;  %v767_v30 = vpop.permute.xlu0 %766  ;;  %v772_v31 = vpop.permute.xlu1 %771 }
 0x21c   :  { %v1100_v57 = vmax.f32 %v911_v49, 0.0  ;;  %v1102_v58 = vmax.f32 %v1024_v50, 0.0 }
 0x21d   :  { %v1101_v61 = vmax.f32 %v913_v53, 0.0  ;;  %v1103_v62 = vmax.f32 %v1026_v54, 0.0 }
 0x21e   :  { %v1156_v1 = vpack.c.bf16 %v1100_v57, %v1096_v55  ;;  %v1158_v3 = vpack.c.bf16 %v1102_v58, %v1098_v56 }
 0x21f   :  { %v1157_v4 = vpack.c.bf16 %v1101_v61, %v1097_v59  ;;  %v1159_v5 = vpack.c.bf16 %v1103_v62, %v1099_v60  ;;  %v916_v6 = vpop.f32.mrb[40].mxu0  ;;  %v1029_v7 = vpop.f32.mrb[40].mxu1 }
 0x220   :  { %v917_v8 = vadd.f32 %v916_v6, %v757_v63  ;;  %v1030_v9 = vadd.f32 %v1029_v7, %v757_v63  ;;  %v918_v10 = vpop.f32.mrb[41].mxu0  ;;  %v1031_v11 = vpop.f32.mrb[41].mxu1 }
 0x221   :  { %v919_v12 = vadd.f32 %v918_v10, %v757_v63  ;;  %v1032_v13 = vadd.f32 %v1031_v11, %v757_v63  ;;  %v920_v14 = vpop.f32.mrb[42].mxu0  ;;  %v1033_v15 = vpop.f32.mrb[42].mxu1  ;;  %1331 = vmatprep.subr.bf16.mxu0 %v1157_v4  ;;  %1414 = vmatprep.subr.bf16.mxu1 %v1159_v5 }
 0x222   :  { %v921_v16 = vadd.f32 %v920_v14, %v762_v0  ;;  %v1034_v17 = vadd.f32 %v1033_v15, %v762_v0  ;;  %v922_v18 = vpop.f32.mrb[43].mxu0  ;;  %v1035_v19 = vpop.f32.mrb[43].mxu1  ;;  %1332 = vmatpush1.bf16.msra.mxu0 %v1156_v1  ;;  %1415 = vmatpush1.bf16.msra.mxu1 %v1158_v3  ;;  %v1104_v22 = vmax.f32 %v917_v8, 0.0  ;;  %v1106_v23 = vmax.f32 %v1030_v9, 0.0 }
 0x223   :  { %v923_v20 = vadd.f32 %v922_v18, %v762_v0  ;;  %v1036_v21 = vadd.f32 %v1035_v19, %v762_v0  ;;  %v1105_v26 = vmax.f32 %v919_v12, 0.0  ;;  %v1107_v27 = vmax.f32 %v1032_v13, 0.0  ;;  %v777_v60 = vpop.permute.xlu0 %776  ;;  %v782_v61 = vpop.permute.xlu1 %781 }
 0x224   :  { %v1108_v24 = vmax.f32 %v921_v16, 0.0  ;;  %v1110_v25 = vmax.f32 %v1034_v17, 0.0 }
 0x225   :  { %v1109_v28 = vmax.f32 %v923_v20, 0.0  ;;  %v1111_v29 = vmax.f32 %v1036_v21, 0.0 }
 0x226   :  { %v1160_v32 = vpack.c.bf16 %v1108_v24, %v1104_v22  ;;  %v1162_v33 = vpack.c.bf16 %v1110_v25, %v1106_v23 }
 0x227   :  { %v1161_v34 = vpack.c.bf16 %v1109_v28, %v1105_v26  ;;  %v1163_v35 = vpack.c.bf16 %v1111_v29, %v1107_v27  ;;  %v926_v36 = vpop.f32.mrb[44].mxu0  ;;  %v1039_v37 = vpop.f32.mrb[44].mxu1 }
 0x228   :  { %v927_v38 = vadd.f32 %v926_v36, %v767_v30  ;;  %v1040_v39 = vadd.f32 %v1039_v37, %v767_v30  ;;  %v928_v40 = vpop.f32.mrb[45].mxu0  ;;  %v1041_v41 = vpop.f32.mrb[45].mxu1 }
 0x229   :  { %v929_v42 = vadd.f32 %v928_v40, %v767_v30  ;;  %v1042_v43 = vadd.f32 %v1041_v41, %v767_v30  ;;  %v930_v44 = vpop.f32.mrb[46].mxu0  ;;  %v1043_v45 = vpop.f32.mrb[46].mxu1  ;;  %1333 = vmatprep.subr.bf16.mxu0 %v1161_v34  ;;  %1416 = vmatprep.subr.bf16.mxu1 %v1163_v35 }
 0x22a   :  { %v931_v46 = vadd.f32 %v930_v44, %v772_v31  ;;  %v1044_v47 = vadd.f32 %v1043_v45, %v772_v31  ;;  %v932_v48 = vpop.f32.mrb[47].mxu0  ;;  %v1045_v49 = vpop.f32.mrb[47].mxu1  ;;  %1334 = vmatpush1.bf16.msra.mxu0 %v1160_v32  ;;  %1417 = vmatpush1.bf16.msra.mxu1 %v1162_v33  ;;  %v1112_v52 = vmax.f32 %v927_v38, 0.0  ;;  %v1114_v53 = vmax.f32 %v1040_v39, 0.0 }
 0x22b   :  { %v933_v50 = vadd.f32 %v932_v48, %v772_v31  ;;  %v1046_v51 = vadd.f32 %v1045_v49, %v772_v31  ;;  %v1113_v56 = vmax.f32 %v929_v42, 0.0  ;;  %v1115_v57 = vmax.f32 %v1042_v43, 0.0  ;;  %v787_v27 = vpop.permute.xlu0 %786  ;;  %v792_v28 = vpop.permute.xlu1 %791 }
 0x22c   :  { %v1116_v54 = vmax.f32 %v931_v46, 0.0  ;;  %v1118_v55 = vmax.f32 %v1044_v47, 0.0 }
 0x22d   :  { %v1117_v58 = vmax.f32 %v933_v50, 0.0  ;;  %v1119_v59 = vmax.f32 %v1046_v51, 0.0 }
 0x22e   :  { %v1164_v62 = vpack.c.bf16 %v1116_v54, %v1112_v52  ;;  %v1166_v63 = vpack.c.bf16 %v1118_v55, %v1114_v53 }
 0x22f   :  { %v1165_v0 = vpack.c.bf16 %v1117_v58, %v1113_v56  ;;  %v1167_v1 = vpack.c.bf16 %v1119_v59, %v1115_v57  ;;  %v936_v3 = vpop.f32.mrb[48].mxu0  ;;  %v1049_v4 = vpop.f32.mrb[48].mxu1 }
 0x230   :  { %v937_v5 = vadd.f32 %v936_v3, %v777_v60  ;;  %v1050_v6 = vadd.f32 %v1049_v4, %v777_v60  ;;  %v938_v7 = vpop.f32.mrb[49].mxu0  ;;  %v1051_v8 = vpop.f32.mrb[49].mxu1 }
 0x231   :  { %v939_v9 = vadd.f32 %v938_v7, %v777_v60  ;;  %v1052_v10 = vadd.f32 %v1051_v8, %v777_v60  ;;  %v940_v11 = vpop.f32.mrb[50].mxu0  ;;  %v1053_v12 = vpop.f32.mrb[50].mxu1  ;;  %1335 = vmatprep.subr.bf16.mxu0 %v1165_v0  ;;  %1418 = vmatprep.subr.bf16.mxu1 %v1167_v1 }
 0x232   :  { %v941_v13 = vadd.f32 %v940_v11, %v782_v61  ;;  %v1054_v14 = vadd.f32 %v1053_v12, %v782_v61  ;;  %v942_v15 = vpop.f32.mrb[51].mxu0  ;;  %v1055_v16 = vpop.f32.mrb[51].mxu1  ;;  %1336 = vmatpush1.bf16.msra.mxu0 %v1164_v62  ;;  %1419 = vmatpush1.bf16.msra.mxu1 %v1166_v63  ;;  %v1120_v19 = vmax.f32 %v937_v5, 0.0  ;;  %v1122_v20 = vmax.f32 %v1050_v6, 0.0 }
 0x233   :  { %v943_v17 = vadd.f32 %v942_v15, %v782_v61  ;;  %v1056_v18 = vadd.f32 %v1055_v16, %v782_v61  ;;  %v1121_v23 = vmax.f32 %v939_v9, 0.0  ;;  %v1123_v24 = vmax.f32 %v1052_v10, 0.0  ;;  %v797_v57 = vpop.permute.xlu0 %796  ;;  %v802_v58 = vpop.permute.xlu1 %801 }
 0x234   :  { %v1124_v21 = vmax.f32 %v941_v13, 0.0  ;;  %v1126_v22 = vmax.f32 %v1054_v14, 0.0 }
 0x235   :  { %v1125_v25 = vmax.f32 %v943_v17, 0.0  ;;  %v1127_v26 = vmax.f32 %v1056_v18, 0.0 }
 0x236   :  { %v1168_v29 = vpack.c.bf16 %v1124_v21, %v1120_v19  ;;  %v1170_v30 = vpack.c.bf16 %v1126_v22, %v1122_v20 }
 0x237   :  { %v1169_v31 = vpack.c.bf16 %v1125_v25, %v1121_v23  ;;  %v1171_v32 = vpack.c.bf16 %v1127_v26, %v1123_v24  ;;  %v946_v33 = vpop.f32.mrb[52].mxu0  ;;  %v1059_v34 = vpop.f32.mrb[52].mxu1 }
 0x238   :  { %v947_v35 = vadd.f32 %v946_v33, %v787_v27  ;;  %v1060_v36 = vadd.f32 %v1059_v34, %v787_v27  ;;  %v948_v37 = vpop.f32.mrb[53].mxu0  ;;  %v1061_v38 = vpop.f32.mrb[53].mxu1 }
 0x239   :  { %v949_v39 = vadd.f32 %v948_v37, %v787_v27  ;;  %v1062_v40 = vadd.f32 %v1061_v38, %v787_v27  ;;  %v950_v41 = vpop.f32.mrb[54].mxu0  ;;  %v1063_v42 = vpop.f32.mrb[54].mxu1  ;;  %1337 = vmatprep.subr.bf16.mxu0 %v1169_v31  ;;  %1420 = vmatprep.subr.bf16.mxu1 %v1171_v32 }
 0x23a   :  { %v951_v43 = vadd.f32 %v950_v41, %v792_v28  ;;  %v1064_v44 = vadd.f32 %v1063_v42, %v792_v28  ;;  %v952_v45 = vpop.f32.mrb[55].mxu0  ;;  %v1065_v46 = vpop.f32.mrb[55].mxu1  ;;  %1338 = vmatpush1.bf16.msra.mxu0 %v1168_v29  ;;  %1421 = vmatpush1.bf16.msra.mxu1 %v1170_v30  ;;  %v1128_v49 = vmax.f32 %v947_v35, 0.0  ;;  %v1130_v50 = vmax.f32 %v1060_v36, 0.0 }
 0x23b   :  { %v953_v47 = vadd.f32 %v952_v45, %v792_v28  ;;  %v1066_v48 = vadd.f32 %v1065_v46, %v792_v28  ;;  %v1129_v53 = vmax.f32 %v949_v39, 0.0  ;;  %v1131_v54 = vmax.f32 %v1062_v40, 0.0  ;;  %v807_v24 = vpop.permute.xlu0 %806  ;;  %v812_v25 = vpop.permute.xlu1 %811 }
 0x23c   :  { %v1132_v51 = vmax.f32 %v951_v43, 0.0  ;;  %v1134_v52 = vmax.f32 %v1064_v44, 0.0 }
 0x23d   :  { %v1133_v55 = vmax.f32 %v953_v47, 0.0  ;;  %v1135_v56 = vmax.f32 %v1066_v48, 0.0 }
 0x23e   :  { %v1172_v59 = vpack.c.bf16 %v1132_v51, %v1128_v49  ;;  %v1174_v60 = vpack.c.bf16 %v1134_v52, %v1130_v50 }
 0x23f   :  { %v1173_v61 = vpack.c.bf16 %v1133_v55, %v1129_v53  ;;  %v1175_v62 = vpack.c.bf16 %v1135_v56, %v1131_v54  ;;  %v956_v63 = vpop.f32.mrb[56].mxu0  ;;  %v1069_v0 = vpop.f32.mrb[56].mxu1 }
 0x240   :  { %v957_v1 = vadd.f32 %v956_v63, %v797_v57  ;;  %v1070_v3 = vadd.f32 %v1069_v0, %v797_v57  ;;  %v958_v4 = vpop.f32.mrb[57].mxu0  ;;  %v1071_v5 = vpop.f32.mrb[57].mxu1  ;;  %v1813_v63 = vld [vmem:[%s2293_s5 + $0x28] sm:$0xff]   ;;  %v1814_v0 = vld [vmem:[%s2293_s5 + $0x30] sm:$0xff]  }
 0x241   :  { %v959_v6 = vadd.f32 %v958_v4, %v797_v57  ;;  %v1072_v7 = vadd.f32 %v1071_v5, %v797_v57  ;;  %v960_v8 = vpop.f32.mrb[58].mxu0  ;;  %v1073_v9 = vpop.f32.mrb[58].mxu1  ;;  %1339 = vmatprep.subr.bf16.mxu0 %v1173_v61  ;;  %1422 = vmatprep.subr.bf16.mxu1 %v1175_v62  ;;  %v1811_v61 = vld [vmem:[%s2293_s5 + $0x18] sm:$0xff]   ;;  %v1812_v62 = vld [vmem:[%s2293_s5 + $0x20] sm:$0xff]  }
 0x242   :  { %v961_v10 = vadd.f32 %v960_v8, %v802_v58  ;;  %v1074_v11 = vadd.f32 %v1073_v9, %v802_v58  ;;  %v962_v12 = vpop.f32.mrb[59].mxu0  ;;  %v1075_v13 = vpop.f32.mrb[59].mxu1  ;;  %1340 = vmatpush1.bf16.msra.mxu0 %v1172_v59  ;;  %1423 = vmatpush1.bf16.msra.mxu1 %v1174_v60  ;;  %v1136_v16 = vmax.f32 %v957_v1, 0.0  ;;  %v1138_v17 = vmax.f32 %v1070_v3, 0.0  ;;  %v1809_v59 = vld [vmem:[%s2293_s5 + $0x8] sm:$0xff]   ;;  %v1810_v60 = vld [vmem:[%s2293_s5 + $0x10] sm:$0xff]  }
 0x243   :  { %v963_v14 = vadd.f32 %v962_v12, %v802_v58  ;;  %v1076_v15 = vadd.f32 %v1075_v13, %v802_v58  ;;  %v1137_v20 = vmax.f32 %v959_v6, 0.0  ;;  %v1139_v21 = vmax.f32 %v1072_v7, 0.0  ;;  %v1808_v58 = vld [vmem:[%s2293_s5] sm:$0xff]   ;;  %v1815_v1 = vld [vmem:[%s2293_s5 + $0x38] sm:$0xff]   ;;  %v1219_v3 = vpop.permute.xlu0 %1218  ;;  %s1882_s5 = smov [#allocation2]  }
 0x244   :  { %v1140_v18 = vmax.f32 %v961_v10, 0.0  ;;  %v1142_v19 = vmax.f32 %v1074_v11, 0.0  ;;  %s1671_s27 = sshll.u32 %s1882_s5, 4  ;;  %s1672_s27 = int_to_ptr.vmem [resolvable:$true] %s1671_s27 }
 0x245   :  { %v1141_v22 = vmax.f32 %v963_v14, 0.0  ;;  %v1143_v23 = vmax.f32 %v1076_v15, 0.0  ;;  %s1856_s28 = scalar_lea.vmem %s1672_s27, 64  ;;  %p1861_p1 = scmp.lt.s32.totalorder %s1672_s27, %s1672_s27 }
 0x246   :  { %v1176_v26 = vpack.c.bf16 %v1140_v18, %v1136_v16  ;;  %v1178_v27 = vpack.c.bf16 %v1142_v19, %v1138_v17  ;;  %p1857_p0 = scmp.ne.s32.totalorder %s1672_s27, %s1856_s28  ;;  %p1862_p2 = scmp.lt.s32.totalorder %s1856_s28, %s1856_s28 }
 0x247   :  { %v1177_v28 = vpack.c.bf16 %v1141_v22, %v1137_v20  ;;  %v1179_v29 = vpack.c.bf16 %v1143_v23, %v1139_v21  ;;  %v966_v30 = vpop.f32.mrb[60].mxu0  ;;  %v1079_v31 = vpop.f32.mrb[60].mxu1 }
 0x248   :  { %v967_v32 = vadd.f32 %v966_v30, %v807_v24  ;;  %v1080_v33 = vadd.f32 %v1079_v31, %v807_v24  ;;  %v968_v34 = vpop.f32.mrb[61].mxu0  ;;  %v1081_v35 = vpop.f32.mrb[61].mxu1  ;;  %p1863_p3 = por %p1862_p2, %p1861_p1 }
 0x249   :  { %v969_v36 = vadd.f32 %v968_v34, %v807_v24  ;;  %v1082_v37 = vadd.f32 %v1081_v35, %v807_v24  ;;  %v970_v38 = vpop.f32.mrb[62].mxu0  ;;  %v1083_v39 = vpop.f32.mrb[62].mxu1  ;;  %1341 = vmatprep.subr.bf16.mxu0 %v1177_v28  ;;  %1424 = vmatprep.subr.bf16.mxu1 %v1179_v29 }
 0x24a   :  { %v971_v40 = vadd.f32 %v970_v38, %v812_v25  ;;  %v1084_v41 = vadd.f32 %v1083_v39, %v812_v25  ;;  %v972_v42 = vpop.f32.mrb[63].mxu0  ;;  %v1085_v43 = vpop.f32.mrb[63].mxu1  ;;  %1342 = vmatpush1.bf16.msra.mxu0 %v1176_v26  ;;  %1425 = vmatpush1.bf16.msra.mxu1 %v1178_v27  ;;  %v1144_v46 = vmax.f32 %v967_v32, 0.0  ;;  %v1146_v47 = vmax.f32 %v1080_v33, 0.0  ;;  %p1864_p4 = pnand %p1863_p3, %p1857_p0 }
 0x24b   :  { %v973_v44 = vadd.f32 %v972_v42, %v812_v25  ;;  %v1086_v45 = vadd.f32 %v1085_v43, %v812_v25  ;;  %v1145_v50 = vmax.f32 %v969_v36, 0.0  ;;  %v1147_v51 = vmax.f32 %v1082_v37, 0.0 }
 0x24c   :  { %v1148_v48 = vmax.f32 %v971_v40, 0.0  ;;  %v1150_v49 = vmax.f32 %v1084_v41, 0.0 }
 0x24d   :  { %v1149_v52 = vmax.f32 %v973_v44, 0.0  ;;  %v1151_v53 = vmax.f32 %v1086_v45, 0.0 }
 0x24e   :  { %v1180_v54 = vpack.c.bf16 %v1148_v48, %v1144_v46  ;;  %v1182_v55 = vpack.c.bf16 %v1150_v49, %v1146_v47 }
 0x24f   :  { %v1181_v56 = vpack.c.bf16 %v1149_v52, %v1145_v50  ;;  %v1183_v57 = vpack.c.bf16 %v1151_v53, %v1147_v51 }
 0x251   :  { %1343 = vmatprep.subr.bf16.mxu0 %v1181_v56  ;;  %1426 = vmatprep.subr.bf16.mxu1 %v1183_v57 }
 0x252   :  { %1344 = vmatpush1.bf16.msra.mxu0 %v1180_v54  ;;  %1427 = vmatpush1.bf16.msra.mxu1 %v1182_v55 }
 0x255   :  { %1362 = vmatmul.mubr.bf16.vlgmr.msra.gmra.mrb[64].mxu0 %v1808_v58  ;;  %1445 = vmatmul.mubr.bf16.vlgmr.msra.gmra.mrb[64].mxu1 %v1808_v58 }
 0x256   :  { %1369 = vmatprep.mubr.bf16.mxu0 %v1880_v2  ;;  %1452 = vmatprep.mubr.bf16.mxu1 %v1880_v2 }
 0x25d   :  { %1370 = vmatmul.mubr.bf16.gmra.mrb[68].mxu0 %v1809_v59  ;;  %1453 = vmatmul.mubr.bf16.gmra.mrb[68].mxu1 %v1809_v59 }
 0x25e   :  { %1375 = vmatprep.mubr.bf16.mxu0 %v1880_v2  ;;  %1458 = vmatprep.mubr.bf16.mxu1 %v1880_v2 }
 0x265   :  { %1376 = vmatmul.mubr.bf16.gmra.mrb[72].mxu0 %v1810_v60  ;;  %1459 = vmatmul.mubr.bf16.gmra.mrb[72].mxu1 %v1810_v60 }
 0x266   :  { %1381 = vmatprep.mubr.bf16.mxu0 %v1880_v2  ;;  %1464 = vmatprep.mubr.bf16.mxu1 %v1880_v2 }
 0x26d   :  { %1382 = vmatmul.mubr.bf16.gmra.mrb[76].mxu0 %v1811_v61  ;;  %1465 = vmatmul.mubr.bf16.gmra.mrb[76].mxu1 %v1811_v61 }
 0x26e   :  { %1387 = vmatprep.mubr.bf16.mxu0 %v1880_v2  ;;  %1470 = vmatprep.mubr.bf16.mxu1 %v1880_v2 }
 0x275   :  { %1388 = vmatmul.mubr.bf16.gmra.mrb[80].mxu0 %v1812_v62  ;;  %1471 = vmatmul.mubr.bf16.gmra.mrb[80].mxu1 %v1812_v62 }
 0x276   :  { %1393 = vmatprep.mubr.bf16.mxu0 %v1880_v2  ;;  %1476 = vmatprep.mubr.bf16.mxu1 %v1880_v2 }
 0x27d   :  { %1394 = vmatmul.mubr.bf16.gmra.mrb[84].mxu0 %v1813_v63  ;;  %1477 = vmatmul.mubr.bf16.gmra.mrb[84].mxu1 %v1813_v63 }
 0x27e   :  { %1399 = vmatprep.mubr.bf16.mxu0 %v1880_v2  ;;  %1482 = vmatprep.mubr.bf16.mxu1 %v1880_v2 }
 0x285   :  { %1400 = vmatmul.mubr.bf16.gmra.mrb[88].mxu0 %v1814_v0  ;;  %1483 = vmatmul.mubr.bf16.gmra.mrb[88].mxu1 %v1814_v0 }
 0x286   :  { %1405 = vmatprep.mubr.bf16.mxu0 %v1880_v2  ;;  %1488 = vmatprep.mubr.bf16.mxu1 %v1880_v2 }
 0x28d   :  { %1406 = vmatmul.mubr.bf16.gmra.mrb[92].mxu0 %v1815_v1  ;;  %1489 = vmatmul.mubr.bf16.gmra.mrb[92].mxu1 %v1815_v1 }
 0x328   :  { %v1363_v4 = vpop.f32.mrb[64].mxu0  ;;  %v1446_v5 = vpop.f32.mrb[64].mxu1 }
 0x329   :  { %v1364_v6 = vadd.f32 %v1363_v4, %v1219_v3  ;;  %v1447_v7 = vadd.f32 %v1446_v5, %v1219_v3  ;;  %v1365_v8 = vpop.f32.mrb[65].mxu0  ;;  %v1448_v9 = vpop.f32.mrb[65].mxu1 }
 0x32a   :  { %v1366_v10 = vadd.f32 %v1365_v8, %v1219_v3  ;;  %v1449_v11 = vadd.f32 %v1448_v9, %v1219_v3  ;;  %v1367_v12 = vpop.f32.mrb[66].mxu0  ;;  %v1450_v13 = vpop.f32.mrb[66].mxu1 }
 0x32b   :  { %v2240_v14 = vmax.f32 %v1364_v6, 0.0  ;;  %v2242_v2 = vmax.f32 %v1447_v7, 0.0  ;;  %v1368_v15 = vpop.f32.mrb[67].mxu0  ;;  %v1451_v16 = vpop.f32.mrb[67].mxu1 }
 0x32c   :  { %v2244_v17 = vmax.f32 %v1366_v10, 0.0  ;;  %v2247_v19 = vmax.f32 %v1449_v11, 0.0 }
 0x32d   :  { %v1527_v18 = vand.u32 2147483647, %v2240_v14  ;;  %v1529_v20 = vand.u32 2147483647, %v2242_v2  ;;  %v1735_v61 = vmul.f32 -1.442695, %v2240_v14 }
 0x32e   :  { %v1528_v22 = vand.u32 2147483647, %v2244_v17  ;;  %v1530_v28 = vand.u32 2147483647, %v2247_v19  ;;  %v1737_v1 = vmul.f32 -1.442695, %v2242_v2 }
 0x32f   :  { %v1531_v21 = vsub.f32 0.0, %v1527_v18  ;;  %v1533_v23 = vsub.f32 0.0, %v1529_v20  ;;  %v1523_v5 = vmax.f32 %v2240_v14, 0.0  ;;  %v1736_v7 = vmul.f32 -1.442695, %v2244_v17 }
 0x330   :  { %v1371_v24 = vpop.f32.mrb[68].mxu0  ;;  %v1454_v25 = vpop.f32.mrb[68].mxu1  ;;  %v1532_v27 = vsub.f32 0.0, %v1528_v22  ;;  %v1534_v34 = vsub.f32 0.0, %v1530_v28  ;;  %v1525_v10 = vmax.f32 %v2242_v2, 0.0  ;;  %v1524_v16 = vmax.f32 %v2244_v17, 0.0 }
 0x331   :  { %v1535_v26 = vmul.f32 1.442695, %v1531_v21  ;;  %v1372_v29 = vpop.f32.mrb[69].mxu0  ;;  %v1539_v30 = vmul.f32 1.442695, %v1533_v23  ;;  %v1455_v31 = vpop.f32.mrb[69].mxu1 }
 0x332   :  { %v1373_v32 = vpop.f32.mrb[70].mxu0  ;;  %v1537_v33 = vmul.f32 1.442695, %v1532_v27  ;;  %v1456_v35 = vpop.f32.mrb[70].mxu1  ;;  %v1541_v38 = vmul.f32 1.442695, %v1534_v34 }
 0x333   :  { %1816 = vpow2.f32 %v1535_v26  ;;  %v1374_v36 = vpop.f32.mrb[71].mxu0  ;;  %v1457_v37 = vpop.f32.mrb[71].mxu1  ;;  %v1738_v24 = vmul.f32 -1.442695, %v2247_v19 }
 0x334   :  { %1818 = vpow2.f32 %v1539_v30 }
 0x335   :  { %1820 = vpow2.f32 %v1537_v33 }
 0x336   :  { %1822 = vpow2.f32 %v1541_v38 }
 0x338   :  { %v1377_v39 = vpop.f32.mrb[72].mxu0  ;;  %v1460_v40 = vpop.f32.mrb[72].mxu1 }
 0x339   :  { %v1378_v41 = vpop.f32.mrb[73].mxu0  ;;  %v1461_v42 = vpop.f32.mrb[73].mxu1 }
 0x33a   :  { %v1379_v43 = vpop.f32.mrb[74].mxu0  ;;  %v1462_v44 = vpop.f32.mrb[74].mxu1 }
 0x33b   :  { %v1380_v45 = vpop.f32.mrb[75].mxu0  ;;  %v1463_v46 = vpop.f32.mrb[75].mxu1 }
 0x33d   :  { %v1817_v47 = vpop.eup %1816 }
 0x33e   :  { %v1819_v48 = vpop.eup %1818  ;;  %v1543_v49 = vadd.f32 1.0, %v1817_v47  ;;  %v1546_v62 = vmul.f32 -0.5, %v1817_v47  ;;  %v1549_v9 = vand.u32 2147483647, %v1817_v47 }
 0x33f   :  { %v2252_v50 = vpop.eup %1820  ;;  %v1561_v51 = vadd.f32 1.0, %v1819_v48  ;;  %v1564_v3 = vmul.f32 -0.5, %v1819_v48  ;;  %v1567_v15 = vand.u32 2147483647, %v1819_v48 }
 0x340   :  { %1824 = vlog2.f32 %v1543_v49  ;;  %v1552_v52 = vadd.f32 1.0, %v2252_v50  ;;  %v1383_v53 = vpop.f32.mrb[76].mxu0  ;;  %v1466_v54 = vpop.f32.mrb[76].mxu1  ;;  %v1555_v4 = vmul.f32 -0.5, %v2252_v50  ;;  %v1547_v6 = vadd.f32 1.0, %v1546_v62 }
 0x341   :  { %v2255_v55 = vpop.eup %1822  ;;  %1826 = vlog2.f32 %v1561_v51  ;;  %v1384_v56 = vpop.f32.mrb[77].mxu0  ;;  %v1565_v11 = vadd.f32 1.0, %v1564_v3  ;;  %v1558_v23 = vand.u32 2147483647, %v2252_v50  ;;  %vm1550_vm0 = vcmp.lt.f32.partialorder %v1549_v9, 0.0004427343 }
 0x342   :  { %v1467_v57 = vpop.f32.mrb[77].mxu1  ;;  %1828 = vlog2.f32 %v1552_v52  ;;  %v1570_v58 = vadd.f32 1.0, %v2255_v55  ;;  %v1385_v59 = vpop.f32.mrb[78].mxu0  ;;  %v1573_v8 = vmul.f32 -0.5, %v2255_v55  ;;  %v1556_v18 = vadd.f32 1.0, %v1555_v4 }
 0x343   :  { %v1468_v60 = vpop.f32.mrb[78].mxu1  ;;  %v1386_v63 = vpop.f32.mrb[79].mxu0  ;;  %v1548_v29 = vmul.f32 %v1817_v47, %v1547_v6  ;;  %v1566_v35 = vmul.f32 %v1819_v48, %v1565_v11  ;;  %v1576_v36 = vand.u32 2147483647, %v2255_v55  ;;  %vm1568_vm1 = vcmp.lt.f32.partialorder %v1567_v15, 0.0004427343 }
 0x344   :  { %v1469_v0 = vpop.f32.mrb[79].mxu1  ;;  %1830 = vlog2.f32 %v1570_v58  ;;  %v1574_v30 = vadd.f32 1.0, %v1573_v8  ;;  %v1557_v39 = vmul.f32 %v2252_v50, %v1556_v18  ;;  %vm1559_vm2 = vcmp.lt.f32.partialorder %v1558_v23, 0.0004427343 }
 0x345   :  { %1832 = vpow2.f32 %v1735_v61  ;;  %v1526_v48 = vmax.f32 %v2247_v19, 0.0  ;;  %vm1577_vm3 = vcmp.lt.f32.partialorder %v1576_v36, 0.0004427343  ;;  %v1881_v36 = vmov 1966171168  }
 0x346   :  { %1834 = vpow2.f32 %v1737_v1  ;;  %v1575_v46 = vmul.f32 %v2255_v55, %v1574_v30 }
 0x347   :  { %1836 = vpow2.f32 %v1736_v7 }
 0x348   :  { %v1389_v12 = vpop.f32.mrb[80].mxu0  ;;  %v1472_v13 = vpop.f32.mrb[80].mxu1  ;;  %1838 = vpow2.f32 %v1738_v24 }
 0x349   :  { %v1390_v20 = vpop.f32.mrb[81].mxu0  ;;  %v1473_v21 = vpop.f32.mrb[81].mxu1 }
 0x34a   :  { %v1825_v22 = vpop.eup %1824  ;;  %v1391_v25 = vpop.f32.mrb[82].mxu0 }
 0x34b   :  { %v1474_v26 = vpop.f32.mrb[82].mxu1  ;;  %v1827_v27 = vpop.eup %1826  ;;  %v1545_v28 = vmul.f32 0.6931472, %v1825_v22 }
 0x34c   :  { %v1392_v31 = vpop.f32.mrb[83].mxu0  ;;  %v1475_v32 = vpop.f32.mrb[83].mxu1  ;;  %v1563_v34 = vmul.f32 0.6931472, %v1827_v27 }
 0x34d   :  { %v1829_v33 = vpop.eup %1828  ;;  %v1551_v37 = vsel %vm1550_vm0, %v1548_v29, %v1545_v28 }
 0x34e   :  { %v1554_v38 = vmul.f32 0.6931472, %v1829_v33  ;;  %v1831_v40 = vpop.eup %1830  ;;  %v1579_v41 = vadd.f32 %v1551_v37, %v1523_v5  ;;  %v1569_v42 = vsel %vm1568_vm1, %v1566_v35, %v1563_v34  ;;  %v1638_v37 = vunpack.c.l.s4 %v1881_v36 }
 0x34f   :  { %v1581_v43 = vadd.f32 %v1569_v42, %v1525_v10  ;;  %v1572_v45 = vmul.f32 0.6931472, %v1831_v40  ;;  %v1833_v53 = vpop.eup %1832 }
 0x350   :  { %v1560_v44 = vsel %vm1559_vm2, %v1557_v39, %v1554_v38  ;;  %v1583_v47 = vmul.f32 0.5, %v1579_v41  ;;  %v1395_v51 = vpop.f32.mrb[84].mxu0  ;;  %v1478_v52 = vpop.f32.mrb[84].mxu1  ;;  %v1511_v3 = vadd.f32 1.0, %v1833_v53  ;;  %v1640_v38 = vlaneseq }
 0x351   :  { %v1580_v49 = vadd.f32 %v1560_v44, %v1524_v16  ;;  %v1585_v54 = vmul.f32 0.5, %v1581_v43  ;;  %v1578_v50 = vsel %vm1577_vm3, %v1575_v46, %v1572_v45  ;;  %v1396_v56 = vpop.f32.mrb[85].mxu0  ;;  %v1479_v57 = vpop.f32.mrb[85].mxu1 }
 0x352   :  { %v1835_v58 = vpop.eup %1834  ;;  %v1587_v59 = vmul.f32 %v1583_v47, %v1579_v41  ;;  %v1582_v61 = vadd.f32 %v1578_v50, %v1526_v48  ;;  %v1397_v62 = vpop.f32.mrb[86].mxu0  ;;  %1840 = vrcp.f32 %v1511_v3  ;;  %v1639_v47 = vunpack.c.0.s8 %v1638_v37 }
 0x353   :  { %v1584_v60 = vmul.f32 0.5, %v1580_v49  ;;  %v1480_v63 = vpop.f32.mrb[86].mxu1  ;;  %v1589_v0 = vmul.f32 %v1585_v54, %v1581_v43  ;;  %v1398_v55 = vpop.f32.mrb[87].mxu0  ;;  %v1513_v8 = vadd.f32 1.0, %v1835_v58  ;;  %vm1662_vm4 = vcmp.lt.s32.totalorder %v1640_v38, 512 }
 0x354   :  { %v1481_v1 = vpop.f32.mrb[87].mxu1  ;;  %v1595_v4 = vrot.slane %v1587_v59, 1  ;;  %v1586_v6 = vmul.f32 0.5, %v1582_v61  ;;  %v1837_v7 = vpop.eup %1836 }
 0x355   :  { %v1588_v5 = vmul.f32 %v1584_v60, %v1580_v49  ;;  %v1597_v9 = vrot.slane %v1589_v0, 1  ;;  %v1839_v15 = vpop.eup %1838  ;;  %1842 = vrcp.f32 %v1513_v8  ;;  %v1512_v24 = vadd.f32 1.0, %v1837_v7 }
 0x356   :  { %v1603_v10 = vadd.f32 %v1595_v4, %v2240_v14  ;;  %v1590_v12 = vmul.f32 %v1586_v6, %v1582_v61  ;;  %v1514_v31 = vadd.f32 1.0, %v1839_v15  ;;  %v1641_v49 = vshrl.u32 %v1640_v38, 7 }
 0x357   :  { %v1596_v11 = vrot.slane %v1588_v5, 1  ;;  %v1605_v13 = vadd.f32 %v1597_v9, %v2242_v2 }
 0x358   :  { %v1607_v16 = vmul.f32 1.442695, %v1603_v10  ;;  %v1598_v20 = vrot.slane %v1590_v12, 1  ;;  %v1401_v21 = vpop.f32.mrb[88].mxu0  ;;  %v1484_v22 = vpop.f32.mrb[88].mxu1  ;;  %v1642_v59 = vsub.s32 %v1639_v47, %v1641_v49 }
 0x359   :  { %v1604_v18 = vadd.f32 %v1596_v11, %v2244_v17  ;;  %v1611_v23 = vmul.f32 1.442695, %v1605_v13  ;;  %v1402_v25 = vpop.f32.mrb[89].mxu0  ;;  %v1485_v26 = vpop.f32.mrb[89].mxu1 }
 0x35a   :  { %1844 = vpow2.f32 %v1607_v16  ;;  %v1606_v14 = vadd.f32 %v1598_v20, %v2247_v19  ;;  %v1403_v28 = vpop.f32.mrb[90].mxu0  ;;  %v1486_v29 = vpop.f32.mrb[90].mxu1 }
 0x35b   :  { %v1609_v27 = vmul.f32 1.442695, %v1604_v18  ;;  %1846 = vpow2.f32 %v1611_v23  ;;  %v1404_v2 = vpop.f32.mrb[91].mxu0  ;;  %v1487_v30 = vpop.f32.mrb[91].mxu1 }
 0x35c   :  { %v1613_v17 = vmul.f32 1.442695, %v1606_v14  ;;  %v1841_v39 = vpop.eup %1840 }
 0x35d   :  { %1848 = vpow2.f32 %v1609_v27 }
 0x35e   :  { %1850 = vrcp.f32 %v1512_v24 }
 0x35f   :  { %1852 = vpow2.f32 %v1613_v17  ;;  %v1843_v41 = vpop.eup %1842 }
 0x360   :  { %1854 = vrcp.f32 %v1514_v31  ;;  %v1407_v32 = vpop.f32.mrb[92].mxu0  ;;  %v1490_v33 = vpop.f32.mrb[92].mxu1 }
 0x361   :  { %v1408_v34 = vpop.f32.mrb[93].mxu0  ;;  %v1491_v35 = vpop.f32.mrb[93].mxu1 }
 0x362   :  { %v1409_v19 = vpop.f32.mrb[94].mxu0  ;;  %v1492_v40 = vpop.f32.mrb[94].mxu1 }
 0x363   :  { %v1410_v42 = vpop.f32.mrb[95].mxu0  ;;  %v1493_v43 = vpop.f32.mrb[95].mxu1 }
 0x364   :  { %v1845_v44 = vpop.eup %1844 }
 0x365   :  { %v1847_v45 = vpop.eup %1846  ;;  %v1619_v46 = vrot.slane %v1845_v44, 1 }
 0x366   :  { %v1621_v51 = vrot.slane %v1847_v45, 1 }
 0x367   :  { %v1849_v48 = vpop.eup %1848  ;;  %v1627_v54 = vmul.f32 %v1841_v39, %v1619_v46 }
 0x368   :  { %v1851_v52 = vpop.eup %1850  ;;  %v1620_v53 = vrot.slane %v1849_v48, 1  ;;  %v1629_v58 = vmul.f32 %v1843_v41, %v1621_v51 }
 0x369   :  { %v1853_v50 = vpop.eup %1852 }
 0x36a   :  { %v1622_v56 = vrot.slane %v1853_v50, 1  ;;  %v1628_v57 = vmul.f32 %v1851_v52, %v1620_v53  ;;  %v1855_v60 = vpop.eup %1854 }
 0x36c   :  { %v1630_v61 = vmul.f32 %v1855_v60, %v1622_v56  ;;  %v1635_v62 = vcombine.low %v1627_v54, %v1628_v57 }
 0x36e   :  { %v1636_v63 = vcombine.low %v1629_v58, %v1630_v61  ;;  %v1643_v0 = vrot.slane %v1635_v62, %v1642_v59 }
 0x370   :  { %v1650_v55 = vrot.slane %v1636_v63, %v1642_v59 }
 0x372   :  { %v1651_v1 = vcombine.low %v1643_v0, %v1650_v55 }
 0x374   :  { %v1658_v3 = vrot.slane %v1651_v1, %v1642_v59 }
 0x376   :  { %1664 = vst.msk [vmem:[#allocation2] sm:$0xf] %vm1662_vm4, %v1658_v3 }
 0x377   :  { %1867 = shalt.err (!%p1864_p4)
}
 0x378   :  { %s1868_s0 = scalar_lea.hbm %s2295_s7, 64 }
 0x379   :  { %p1869_p5 = scmp.ne.s32.totalorder %s2295_s7, %s1868_s0  ;;  %p1872_p6 = scmp.lt.u32.totalorder %s1868_s0, %s2295_s7 }
 0x37b   :  { %p1874_p7 = pnand %p1872_p6, %p1869_p5 }
 0x37d   :  { %1877 = shalt.err (!%p1874_p7)
}
 0x37e   :  { %1674 = dma.vmem_to_hbm [thread:$0]  %s1672_s27, 64, %s2295_s7, [#allocation3]  }
 0x37f   :  { %1878 = dma.done.wait [#allocation3], 64  }
 0x380   :  { %1879 = vsyncadd [#allocation3], 4294967232 }
 0x381   :  { %1678 = vsyncpa [#allocation3], 1 }

</bundles_post_ra>
